<compile_context>
chip_gen: v7x
topology: tpu7x:2x2x1
jax: 0.10.0
libtpu: 0.0.40
codegen_flags: <defaults>
</compile_context>

<pallas_src>
import functools

import jax
import jax.numpy as jnp
from jax.experimental import pallas as pl
from jax.experimental.pallas import tpu as pltpu


_PAD_DIST = 1e30  # distance stored in zero-padded key columns (never selected)


def _edge_conv_kernel(xq_ref, keys_ref, src2_ref, wb_ref, wn_ref, b_ref, o_ref,
                      *, k: int, s_pad: int, gather_in_out: bool, unroll: int):
    """EdgeConv for one (batch, query-tile) grid step.

    xq_ref   : (1, C_pad, TQ)   x rows of the query slab (view into keys array)
    keys_ref : (1, C_ext, N)    rows [0:C_pad] = x, row C_pad = ||x_j||^2
                                (+1e30 pad mask), remaining rows zero
    src2_ref : (1, 2*S, N) bf16 [hi; lo] split of the gather source
                                (w2 @ x if gather_in_out else x)
    wb_ref   : (O, C_pad)       w1 - w2  (applied to the center point)
    wn_ref   : (O, C_pad)       w2       (applied post-gather if not gather_in_out)
    b_ref    : (O, 1)           folded bias
    o_ref    : (1, O, TQ)       relu(conv) max-pooled over the k neighbors
    """
    xq = xq_ref[0]                                        # (C_pad, TQ) f32
    keys = keys_ref[0]                                    # (C_ext, N)  f32
    src2 = src2_ref[0]                                    # (2S, N)     bf16
    c_pad, tq = xq.shape
    c_ext, n = keys.shape
    o_dim = o_ref.shape[1]

    # Fused distance slab: d[i, j] = ||x_j||^2(+pad) - 2 <x_i, x_j>, built with
    # a single f32 MXU contraction.  The ones row of A lines up with the norm
    # row of `keys`; remaining pad rows of `keys` are zero.
    pad_rows = c_ext - c_pad
    tail = jnp.where(
        jax.lax.broadcasted_iota(jnp.int32, (pad_rows, tq), 0) == 0,
        1.0, 0.0).astype(jnp.float32)                      # (pad_rows, TQ)
    a_mat = jnp.concatenate([-2.0 * xq, tail], axis=0)     # (C_ext, TQ)
    d0 = jax.lax.dot_general(
        a_mat, keys, (((0,), (0,)), ((), ())),
        preferred_element_type=jnp.float32)                # (TQ, N)

    # Center-point contribution: (W1 - W2) @ x_i + b   (once per slab, f32).
    base = jnp.dot(wb_ref[...], xq,
                   preferred_element_type=jnp.float32) + b_ref[...]   # (O, TQ)

    col = jax.lax.broadcasted_iota(jnp.int32, (tq, n), 1)

    def body(_, carry):
        d, acc = carry
        # Nearest remaining neighbor: min distance, smallest column on ties
        # (matches top_k order).  Selected columns are then masked to +inf.
        row_min = jnp.min(d, axis=1, keepdims=True)                    # (TQ, 1)
        sel = jnp.min(jnp.where(d <= row_min, col, n), axis=1,
                      keepdims=True)                                   # (TQ, 1)
        eq = col == sel                                                # (TQ, N)
        onehot = jnp.where(eq, 1.0, 0.0).astype(jnp.bfloat16)
        # Single bf16 one-hot gather of the stacked [hi; lo] source.
        g2 = jax.lax.dot_general(
            src2, onehot, (((1,), (1,)), ((), ())),
            preferred_element_type=jnp.float32)                        # (2S, TQ)
        g = g2[:s_pad] + g2[s_pad:]                                    # (S, TQ)
        if not gather_in_out:
            g = jnp.dot(wn_ref[...], g, preferred_element_type=jnp.float32)
        acc = jnp.maximum(acc, g)                                      # (O, TQ)
        d = jnp.where(eq, jnp.inf, d)
        return d, acc

    init = (d0, jnp.full((o_dim, tq), -jnp.inf, jnp.float32))
    # NOTE: assumes 1 <= k <= N (checked in the wrapper; same as top_k).
    _, acc = jax.lax.fori_loop(0, k, body, init, unroll=unroll)

    # Bias + ReLU hoisted out of the loop (both monotone in the gathered term).
    o_ref[0] = jnp.maximum(base + acc, 0.0)


def _round_up(v: int, m: int) -> int:
    return (v + m - 1) // m * m


def edge_conv_forward(feat, w_eff, b_eff, k):
    """feat: (B, C, N) float32 -> (B, O, N, 1) float32 (pool=True, keepdim)."""
    B, C, N = feat.shape
    O = w_eff.shape[0]
    if not (1 <= k <= N):
        raise ValueError(f"k={k} must be in [1, N={N}]")

    C_pad = _round_up(C, 8)
    O_pad = _round_up(O, 8)
    N_pad = _round_up(N, 128)
    C_ext = C_pad + 8            # extra row block holding ||x_j||^2 (+ zero pad)

    gather_in_out = O_pad <= C_pad          # gather in the cheaper dimension
    S_pad = O_pad if gather_in_out else C_pad

    # ---- tile size / VMEM budget (v5e/v6e: 128 MiB, v7x: 64 MiB per core) ----
    try:
        vmem_cap = int(pltpu.get_tpu_info().vmem_capacity_bytes)
    except Exception:
        vmem_cap = 64 * 1024 * 1024

    def footprint(tq):
        xq_b = C_pad * tq * 4 * 2                       # query slab, dbl-buffered
        keys_b = C_ext * N_pad * 4 * 2                  # f32 key block
        src_b = 2 * S_pad * N_pad * 2 * 2               # bf16 [hi; lo] source
        out_b = O_pad * tq * 4 * 2
        w_b = (2 * O_pad * C_pad + O_pad) * 4 * 2
        tmp_b = 10 * tq * N_pad * 4                     # d/col/unrolled temps
        return xq_b + keys_b + src_b + out_b + w_b + tmp_b

    TQ = 128
    for cand in (512, 256):
        if (N_pad % cand == 0 and footprint(cand) <= int(0.55 * vmem_cap)
                and B * (N_pad // cand) >= 2):          # keep both v7x cores busy
            TQ = cand
            break
    vmem_limit = min(int(0.75 * vmem_cap), 96 * 1024 * 1024)
    vmem_limit = max(vmem_limit,
                     min(footprint(TQ) + (4 << 20), int(0.9 * vmem_cap)))

    # ---- per-batch invariants, computed once outside the kernel ----
    feat_p = jnp.pad(feat, ((0, 0), (0, C_pad - C), (0, N_pad - N)))
    xx = jnp.sum(feat_p * feat_p, axis=1, keepdims=True)              # (B,1,Np)
    valid = (jnp.arange(N_pad) < N)[None, None, :]
    xx = jnp.where(valid, xx, _PAD_DIST)
    keys = jnp.concatenate(
        [feat_p, xx, jnp.zeros((B, C_ext - C_pad - 1, N_pad), jnp.float32)],
        axis=1)                                                       # (B,C_ext,Np)

    w1 = w_eff[:, :C]
    w2 = w_eff[:, C:]
    wb = jnp.pad(w1 - w2, ((0, O_pad - O), (0, C_pad - C)))           # (Op, Cp)
    wn = jnp.pad(w2, ((0, O_pad - O), (0, C_pad - C)))                # (Op, Cp)
    bp = jnp.pad(b_eff, ((0, O_pad - O), (0, 0)))                     # (Op, 1)

    src = jnp.einsum("oc,bcn->bon", wn, feat_p) if gather_in_out else feat_p
    src_hi = src.astype(jnp.bfloat16)
    src_lo = (src - src_hi.astype(jnp.float32)).astype(jnp.bfloat16)
    src2 = jnp.concatenate([src_hi, src_lo], axis=1)                  # (B,2S,Np)

    kernel = functools.partial(
        _edge_conv_kernel, k=k, s_pad=S_pad,
        gather_in_out=gather_in_out, unroll=min(4, k))

    out = pl.pallas_call(
        kernel,
        out_shape=jax.ShapeDtypeStruct((B, O_pad, N_pad), jnp.float32),
        grid_spec=pltpu.PrefetchScalarGridSpec(
            num_scalar_prefetch=0,
            grid=(B, N_pad // TQ),
            in_specs=[
                pl.BlockSpec((1, C_pad, TQ), lambda b, q: (b, 0, q)),     # query slab
                pl.BlockSpec((1, C_ext, N_pad), lambda b, q: (b, 0, 0)),  # full keys
                pl.BlockSpec((1, 2 * S_pad, N_pad), lambda b, q: (b, 0, 0)),
                pl.BlockSpec((O_pad, C_pad), lambda b, q: (0, 0)),
                pl.BlockSpec((O_pad, C_pad), lambda b, q: (0, 0)),
                pl.BlockSpec((O_pad, 1), lambda b, q: (0, 0)),
            ],
            out_specs=pl.BlockSpec((1, O_pad, TQ), lambda b, q: (b, 0, q)),
        ),
        compiler_params=pltpu.CompilerParams(
            dimension_semantics=("parallel", "parallel"),
            vmem_limit_bytes=vmem_limit,
        ),
    )(keys, keys, src2, wb, wn, bp)

    return out[:, :O, :N][..., None]


def edge_conv_reference(feat, w_eff, b_eff, k):
    """Pure-JAX reference of the same forward pass (for validation)."""
    B, C, N = feat.shape
    xx = jnp.sum(feat * feat, axis=1)                               # (B, N)
    gram = jnp.einsum("bcn,bcm->bnm", feat, feat)                   # (B, N, N)
    dist = xx[:, :, None] + xx[:, None, :] - 2.0 * gram             # (B, N, N)
    _, idx = jax.lax.top_k(-dist, k)                                # (B, N, k)
    nbr = jax.vmap(lambda f, i: f[:, i])(feat, idx)                 # (B, C, N, k)
    center = feat[:, :, :, None]
    edge = jnp.concatenate([jnp.broadcast_to(center, nbr.shape), nbr - center], axis=1)
    conv = jnp.einsum("oc,bcnk->bonk", w_eff, edge) + b_eff.reshape(1, -1, 1, 1)
    y = jnp.maximum(conv, 0.0)
    return jnp.max(y, axis=-1, keepdims=True)                       # (B, O, N, 1)


def init_params(key, in_channel, out_channel, bn_eps=1e-5):
    """Deterministic synthetic parameters with BatchNorm folded into the conv."""
    k_w, k_b, k_g, k_be, k_m, k_v = jax.random.split(key, 6)
    cin2 = 2 * in_channel
    conv_w = jax.random.normal(k_w, (out_channel, cin2), jnp.float32) * (1.0 / jnp.sqrt(cin2))
    conv_b = jax.random.normal(k_b, (out_channel,), jnp.float32) * 0.1
    gamma = 1.0 + 0.1 * jax.random.normal(k_g, (out_channel,), jnp.float32)
    beta = 0.1 * jax.random.normal(k_be, (out_channel,), jnp.float32)
    run_mean = 0.1 * jax.random.normal(k_m, (out_channel,), jnp.float32)
    run_var = 1.0 + 0.1 * jax.random.uniform(k_v, (out_channel,), jnp.float32)
    scale = gamma / jnp.sqrt(run_var + bn_eps)
    w_eff = conv_w * scale[:, None]                                 # (O, 2C)
    b_eff = (scale * (conv_b - run_mean) + beta)[:, None]           # (O, 1)
    return w_eff, b_eff


if __name__ == "__main__":
    # Small shapes consistent with forward: B x C x N input, k neighbors.
    # TODO(synk): pool=False branch (returns B x O x N x k) is not implemented.
    key = jax.random.PRNGKey(0)

    # Config 1: O_pad <= C_pad -> gather happens in the output dimension.
    B, C, N, K, OUT = 2, 4, 16, 4, 8          # k=20 default; reduced since N=16
    k_feat, k_par, key = jax.random.split(key, 3)
    feat = jax.random.normal(k_feat, (B, C, N), jnp.float32)
    w_eff, b_eff = init_params(k_par, C, OUT)
    out = jax.block_until_ready(edge_conv_forward(feat, w_eff, b_eff, K))
    ref = edge_conv_reference(feat, w_eff, b_eff, K)
    assert out.shape == (B, OUT, N, 1), out.shape
    assert jnp.allclose(out, ref, rtol=1e-4, atol=1e-4), "mismatch (config 1)"

    # Config 2: O_pad > C_pad -> gather x, apply W2 after the gather.
    B2, C2, N2, K2, OUT2 = 2, 4, 16, 4, 16
    k_feat2, k_par2, key = jax.random.split(key, 3)
    feat2 = jax.random.normal(k_feat2, (B2, C2, N2), jnp.float32)
    w_eff2, b_eff2 = init_params(k_par2, C2, OUT2)
    out2 = jax.block_until_ready(edge_conv_forward(feat2, w_eff2, b_eff2, K2))
    ref2 = edge_conv_reference(feat2, w_eff2, b_eff2, K2)
    assert out2.shape == (B2, OUT2, N2, 1), out2.shape
    assert jnp.allclose(out2, ref2, rtol=1e-4, atol=1e-4), "mismatch (config 2)"

    print("KERNEL_OK")
</pallas_src>

<mosaic_0001>
module attributes {stable_mosaic.version = 11 : i64} {
  func.func @_edge_conv_kernel(%arg0: i32, %arg1: i32, %arg2: memref<1x8x128xf32, #tpu.memory_space<vmem>>, %arg3: memref<1x16x128xf32, #tpu.memory_space<vmem>>, %arg4: memref<1x16x128xbf16, #tpu.memory_space<vmem>>, %arg5: memref<8x8xf32, #tpu.memory_space<vmem>>, %arg6: memref<8x8xf32, #tpu.memory_space<vmem>>, %arg7: memref<8x1xf32, #tpu.memory_space<vmem>>, %arg8: memref<1x8x128xf32, #tpu.memory_space<vmem>>) attributes {dimension_semantics = [#tpu.dimension_semantics<parallel>, #tpu.dimension_semantics<parallel>], iteration_bounds = array<i64: 2, 1>, scalar_prefetch = 0 : i64, scratch_operands = 0 : i64, tpu.core_type = #tpu.core_type<tc>, window_params = [{transform_indices = @transform_0, window_bounds = array<i64: 1, 8, 128>}, {transform_indices = @transform_1, window_bounds = array<i64: 1, 16, 128>}, {transform_indices = @transform_2, window_bounds = array<i64: 1, 16, 128>}, {pipeline_mode = #tpu.pipeline_mode<synchronous>, transform_indices = @transform_3, window_bounds = array<i64: 8, 8>}, {pipeline_mode = #tpu.pipeline_mode<synchronous>, transform_indices = @transform_4, window_bounds = array<i64: 8, 8>}, {pipeline_mode = #tpu.pipeline_mode<synchronous>, transform_indices = @transform_5, window_bounds = array<i64: 8, 1>}, {transform_indices = @transform_6, window_bounds = array<i64: 1, 8, 128>}]} {
    %c0 = arith.constant 0 : index
    %c0_0 = arith.constant 0 : index
    %c0_1 = arith.constant 0 : index
    %0 = vector.load %arg2[%c0, %c0_0, %c0_1] : memref<1x8x128xf32, #tpu.memory_space<vmem>>, vector<1x8x128xf32>
    %1 = vector.shape_cast %0 : vector<1x8x128xf32> to vector<8x128xf32>
    %c0_2 = arith.constant 0 : index
    %c0_3 = arith.constant 0 : index
    %c0_4 = arith.constant 0 : index
    %2 = vector.load %arg3[%c0_2, %c0_3, %c0_4] : memref<1x16x128xf32, #tpu.memory_space<vmem>>, vector<1x16x128xf32>
    %3 = vector.shape_cast %2 : vector<1x16x128xf32> to vector<16x128xf32>
    %c0_5 = arith.constant 0 : index
    %c0_6 = arith.constant 0 : index
    %c0_7 = arith.constant 0 : index
    %4 = vector.load %arg4[%c0_5, %c0_6, %c0_7] : memref<1x16x128xbf16, #tpu.memory_space<vmem>>, vector<1x16x128xbf16>
    %5 = vector.shape_cast %4 : vector<1x16x128xbf16> to vector<16x128xbf16>
    %6 = tpu.iota {dimensions = array<i32: 0>} : vector<8x128xi32>
    %c0_i32 = arith.constant 0 : i32
    %7 = vector.broadcast %c0_i32 : i32 to vector<8x128xi32>
    %8 = arith.cmpi eq, %6, %7 : vector<8x128xi32>
    %cst = arith.constant 1.000000e+00 : f32
    %cst_8 = arith.constant 0.000000e+00 : f32
    %9 = vector.broadcast %cst : f32 to vector<8x128xf32>
    %10 = vector.broadcast %cst_8 : f32 to vector<8x128xf32>
    %11 = arith.select %8, %9, %10 : vector<8x128xi1>, vector<8x128xf32>
    %cst_9 = arith.constant -2.000000e+00 : f32
    %12 = vector.broadcast %cst_9 : f32 to vector<8x128xf32>
    %13 = arith.mulf %12, %1 : vector<8x128xf32>
    %14 = tpu.concatenate %13, %11 in 0 : vector<8x128xf32>, vector<8x128xf32> -> vector<16x128xf32>
    %cst_10 = arith.constant dense<0.000000e+00> : vector<128x128xf32>
    %15 = tpu.matmul %14, %3, %cst_10 {dimension_numbers = #tpu.dot_dimension_numbers<[0], [0], [1], [1], [0, 1, 1, 1], [], []>} : vector<16x128xf32>, vector<16x128xf32>, vector<128x128xf32> -> vector<128x128xf32>
    %c0_11 = arith.constant 0 : index
    %c0_12 = arith.constant 0 : index
    %16 = vector.load %arg5[%c0_11, %c0_12] : memref<8x8xf32, #tpu.memory_space<vmem>>, vector<8x8xf32>
    %cst_13 = arith.constant dense<0.000000e+00> : vector<8x128xf32>
    %17 = tpu.matmul %16, %1, %cst_13 {dimension_numbers = #tpu.dot_dimension_numbers<[1], [0], [0], [1], [0, 0, 1, 1], [], []>} : vector<8x8xf32>, vector<8x128xf32>, vector<8x128xf32> -> vector<8x128xf32>
    %c0_14 = arith.constant 0 : index
    %c0_15 = arith.constant 0 : index
    %18 = vector.load %arg7[%c0_14, %c0_15] : memref<8x1xf32, #tpu.memory_space<vmem>>, vector<8x1xf32>
    %19 = vector.broadcast %18 : vector<8x1xf32> to vector<8x128xf32>
    %20 = arith.addf %17, %19 : vector<8x128xf32>
    %21 = tpu.iota {dimensions = array<i32: 1>} : vector<128x128xi32>
    %cst_16 = arith.constant 0xFF800000 : f32
    %22 = vector.broadcast %cst_16 : f32 to vector<8x128xf32>
    %c0_i32_17 = arith.constant 0 : i32
    %cst_18 = arith.constant dense<0x7F800000> : vector<128xf32>
    %23 = vector.multi_reduction <minimumf>, %15, %cst_18 [1] : vector<128x128xf32> to vector<128xf32>
    %24 = vector.shape_cast %23 : vector<128xf32> to vector<128x1xf32>
    %25 = vector.broadcast %24 : vector<128x1xf32> to vector<128x128xf32>
    %26 = arith.cmpf ole, %15, %25 : vector<128x128xf32>
    %c128_i32 = arith.constant 128 : i32
    %27 = vector.broadcast %c128_i32 : i32 to vector<128x128xi32>
    %28 = arith.select %26, %21, %27 : vector<128x128xi1>, vector<128x128xi32>
    %cst_19 = arith.constant dense<2147483647> : vector<128xi32>
    %29 = vector.multi_reduction <minsi>, %28, %cst_19 [1] : vector<128x128xi32> to vector<128xi32>
    %30 = vector.shape_cast %29 : vector<128xi32> to vector<128x1xi32>
    %31 = vector.broadcast %30 : vector<128x1xi32> to vector<128x128xi32>
    %32 = arith.cmpi eq, %21, %31 : vector<128x128xi32>
    %cst_20 = arith.constant 1.000000e+00 : f32
    %cst_21 = arith.constant 0.000000e+00 : f32
    %33 = vector.broadcast %cst_20 : f32 to vector<128x128xf32>
    %34 = vector.broadcast %cst_21 : f32 to vector<128x128xf32>
    %35 = arith.select %32, %33, %34 : vector<128x128xi1>, vector<128x128xf32>
    %36 = arith.truncf %35 : vector<128x128xf32> to vector<128x128xbf16>
    %cst_22 = arith.constant dense<0.000000e+00> : vector<16x128xf32>
    %37 = tpu.matmul %5, %36, %cst_22 {dimension_numbers = #tpu.dot_dimension_numbers<[1], [1], [0], [0], [0, 0, 1, 0], [], []>} : vector<16x128xbf16>, vector<128x128xbf16>, vector<16x128xf32> -> vector<16x128xf32>
    %38 = vector.extract_strided_slice %37 {offsets = [0, 0], sizes = [8, 128], strides = [1, 1]} : vector<16x128xf32> to vector<8x128xf32>
    %39 = vector.extract_strided_slice %37 {offsets = [8, 0], sizes = [8, 128], strides = [1, 1]} : vector<16x128xf32> to vector<8x128xf32>
    %40 = arith.addf %38, %39 : vector<8x128xf32>
    %41 = arith.maximumf %22, %40 : vector<8x128xf32>
    %cst_23 = arith.constant 0x7F800000 : f32
    %42 = vector.broadcast %cst_23 : f32 to vector<128x128xf32>
    %43 = arith.select %32, %42, %15 : vector<128x128xi1>, vector<128x128xf32>
    %c1_i32 = arith.constant 1 : i32
    %cst_24 = arith.constant dense<0x7F800000> : vector<128xf32>
    %44 = vector.multi_reduction <minimumf>, %43, %cst_24 [1] : vector<128x128xf32> to vector<128xf32>
    %45 = vector.shape_cast %44 : vector<128xf32> to vector<128x1xf32>
    %46 = vector.broadcast %45 : vector<128x1xf32> to vector<128x128xf32>
    %47 = arith.cmpf ole, %43, %46 : vector<128x128xf32>
    %c128_i32_25 = arith.constant 128 : i32
    %48 = vector.broadcast %c128_i32_25 : i32 to vector<128x128xi32>
    %49 = arith.select %47, %21, %48 : vector<128x128xi1>, vector<128x128xi32>
    %cst_26 = arith.constant dense<2147483647> : vector<128xi32>
    %50 = vector.multi_reduction <minsi>, %49, %cst_26 [1] : vector<128x128xi32> to vector<128xi32>
    %51 = vector.shape_cast %50 : vector<128xi32> to vector<128x1xi32>
    %52 = vector.broadcast %51 : vector<128x1xi32> to vector<128x128xi32>
    %53 = arith.cmpi eq, %21, %52 : vector<128x128xi32>
    %cst_27 = arith.constant 1.000000e+00 : f32
    %cst_28 = arith.constant 0.000000e+00 : f32
    %54 = vector.broadcast %cst_27 : f32 to vector<128x128xf32>
    %55 = vector.broadcast %cst_28 : f32 to vector<128x128xf32>
    %56 = arith.select %53, %54, %55 : vector<128x128xi1>, vector<128x128xf32>
    %57 = arith.truncf %56 : vector<128x128xf32> to vector<128x128xbf16>
    %cst_29 = arith.constant dense<0.000000e+00> : vector<16x128xf32>
    %58 = tpu.matmul %5, %57, %cst_29 {dimension_numbers = #tpu.dot_dimension_numbers<[1], [1], [0], [0], [0, 0, 1, 0], [], []>} : vector<16x128xbf16>, vector<128x128xbf16>, vector<16x128xf32> -> vector<16x128xf32>
    %59 = vector.extract_strided_slice %58 {offsets = [0, 0], sizes = [8, 128], strides = [1, 1]} : vector<16x128xf32> to vector<8x128xf32>
    %60 = vector.extract_strided_slice %58 {offsets = [8, 0], sizes = [8, 128], strides = [1, 1]} : vector<16x128xf32> to vector<8x128xf32>
    %61 = arith.addf %59, %60 : vector<8x128xf32>
    %62 = arith.maximumf %41, %61 : vector<8x128xf32>
    %cst_30 = arith.constant 0x7F800000 : f32
    %63 = vector.broadcast %cst_30 : f32 to vector<128x128xf32>
    %64 = arith.select %53, %63, %43 : vector<128x128xi1>, vector<128x128xf32>
    %c2_i32 = arith.constant 2 : i32
    %cst_31 = arith.constant dense<0x7F800000> : vector<128xf32>
    %65 = vector.multi_reduction <minimumf>, %64, %cst_31 [1] : vector<128x128xf32> to vector<128xf32>
    %66 = vector.shape_cast %65 : vector<128xf32> to vector<128x1xf32>
    %67 = vector.broadcast %66 : vector<128x1xf32> to vector<128x128xf32>
    %68 = arith.cmpf ole, %64, %67 : vector<128x128xf32>
    %c128_i32_32 = arith.constant 128 : i32
    %69 = vector.broadcast %c128_i32_32 : i32 to vector<128x128xi32>
    %70 = arith.select %68, %21, %69 : vector<128x128xi1>, vector<128x128xi32>
    %cst_33 = arith.constant dense<2147483647> : vector<128xi32>
    %71 = vector.multi_reduction <minsi>, %70, %cst_33 [1] : vector<128x128xi32> to vector<128xi32>
    %72 = vector.shape_cast %71 : vector<128xi32> to vector<128x1xi32>
    %73 = vector.broadcast %72 : vector<128x1xi32> to vector<128x128xi32>
    %74 = arith.cmpi eq, %21, %73 : vector<128x128xi32>
    %cst_34 = arith.constant 1.000000e+00 : f32
    %cst_35 = arith.constant 0.000000e+00 : f32
    %75 = vector.broadcast %cst_34 : f32 to vector<128x128xf32>
    %76 = vector.broadcast %cst_35 : f32 to vector<128x128xf32>
    %77 = arith.select %74, %75, %76 : vector<128x128xi1>, vector<128x128xf32>
    %78 = arith.truncf %77 : vector<128x128xf32> to vector<128x128xbf16>
    %cst_36 = arith.constant dense<0.000000e+00> : vector<16x128xf32>
    %79 = tpu.matmul %5, %78, %cst_36 {dimension_numbers = #tpu.dot_dimension_numbers<[1], [1], [0], [0], [0, 0, 1, 0], [], []>} : vector<16x128xbf16>, vector<128x128xbf16>, vector<16x128xf32> -> vector<16x128xf32>
    %80 = vector.extract_strided_slice %79 {offsets = [0, 0], sizes = [8, 128], strides = [1, 1]} : vector<16x128xf32> to vector<8x128xf32>
    %81 = vector.extract_strided_slice %79 {offsets = [8, 0], sizes = [8, 128], strides = [1, 1]} : vector<16x128xf32> to vector<8x128xf32>
    %82 = arith.addf %80, %81 : vector<8x128xf32>
    %83 = arith.maximumf %62, %82 : vector<8x128xf32>
    %cst_37 = arith.constant 0x7F800000 : f32
    %84 = vector.broadcast %cst_37 : f32 to vector<128x128xf32>
    %85 = arith.select %74, %84, %64 : vector<128x128xi1>, vector<128x128xf32>
    %c3_i32 = arith.constant 3 : i32
    %cst_38 = arith.constant dense<0x7F800000> : vector<128xf32>
    %86 = vector.multi_reduction <minimumf>, %85, %cst_38 [1] : vector<128x128xf32> to vector<128xf32>
    %87 = vector.shape_cast %86 : vector<128xf32> to vector<128x1xf32>
    %88 = vector.broadcast %87 : vector<128x1xf32> to vector<128x128xf32>
    %89 = arith.cmpf ole, %85, %88 : vector<128x128xf32>
    %c128_i32_39 = arith.constant 128 : i32
    %90 = vector.broadcast %c128_i32_39 : i32 to vector<128x128xi32>
    %91 = arith.select %89, %21, %90 : vector<128x128xi1>, vector<128x128xi32>
    %cst_40 = arith.constant dense<2147483647> : vector<128xi32>
    %92 = vector.multi_reduction <minsi>, %91, %cst_40 [1] : vector<128x128xi32> to vector<128xi32>
    %93 = vector.shape_cast %92 : vector<128xi32> to vector<128x1xi32>
    %94 = vector.broadcast %93 : vector<128x1xi32> to vector<128x128xi32>
    %95 = arith.cmpi eq, %21, %94 : vector<128x128xi32>
    %cst_41 = arith.constant 1.000000e+00 : f32
    %cst_42 = arith.constant 0.000000e+00 : f32
    %96 = vector.broadcast %cst_41 : f32 to vector<128x128xf32>
    %97 = vector.broadcast %cst_42 : f32 to vector<128x128xf32>
    %98 = arith.select %95, %96, %97 : vector<128x128xi1>, vector<128x128xf32>
    %99 = arith.truncf %98 : vector<128x128xf32> to vector<128x128xbf16>
    %cst_43 = arith.constant dense<0.000000e+00> : vector<16x128xf32>
    %100 = tpu.matmul %5, %99, %cst_43 {dimension_numbers = #tpu.dot_dimension_numbers<[1], [1], [0], [0], [0, 0, 1, 0], [], []>} : vector<16x128xbf16>, vector<128x128xbf16>, vector<16x128xf32> -> vector<16x128xf32>
    %101 = vector.extract_strided_slice %100 {offsets = [0, 0], sizes = [8, 128], strides = [1, 1]} : vector<16x128xf32> to vector<8x128xf32>
    %102 = vector.extract_strided_slice %100 {offsets = [8, 0], sizes = [8, 128], strides = [1, 1]} : vector<16x128xf32> to vector<8x128xf32>
    %103 = arith.addf %101, %102 : vector<8x128xf32>
    %104 = arith.maximumf %83, %103 : vector<8x128xf32>
    %cst_44 = arith.constant 0x7F800000 : f32
    %105 = vector.broadcast %cst_44 : f32 to vector<128x128xf32>
    %106 = arith.select %95, %105, %85 : vector<128x128xi1>, vector<128x128xf32>
    %107 = arith.addf %20, %104 : vector<8x128xf32>
    %cst_45 = arith.constant 0.000000e+00 : f32
    %108 = vector.broadcast %cst_45 : f32 to vector<8x128xf32>
    %109 = arith.maximumf %107, %108 : vector<8x128xf32>
    %c0_46 = arith.constant 0 : index
    %c0_47 = arith.constant 0 : index
    %c0_48 = arith.constant 0 : index
    %110 = vector.load %arg8[%c0_46, %c0_47, %c0_48] : memref<1x8x128xf32, #tpu.memory_space<vmem>>, vector<1x8x128xf32>
    %111 = vector.shape_cast %110 : vector<1x8x128xf32> to vector<8x128xf32>
    %112 = vector.shape_cast %109 : vector<8x128xf32> to vector<1x8x128xf32>
    tpu.vector_store %arg8[%c0_46, %c0_47, %c0_48], %112 {strides = array<i32>} : memref<1x8x128xf32, #tpu.memory_space<vmem>>, vector<1x8x128xf32>,
    return
  }
  func.func @transform_0(%arg0: i32, %arg1: i32) -> (i32, i32, i32) {
    %c0_i32 = arith.constant 0 : i32
    %c0_i32_0 = arith.constant 0 : i32
    return %arg0, %c0_i32, %arg1 : i32, i32, i32
  }
  func.func @transform_1(%arg0: i32, %arg1: i32) -> (i32, i32, i32) {
    %c0_i32 = arith.constant 0 : i32
    %c0_i32_0 = arith.constant 0 : i32
    %c0_i32_1 = arith.constant 0 : i32
    return %arg0, %c0_i32, %c0_i32_0 : i32, i32, i32
  }
  func.func @transform_2(%arg0: i32, %arg1: i32) -> (i32, i32, i32) {
    %c0_i32 = arith.constant 0 : i32
    %c0_i32_0 = arith.constant 0 : i32
    %c0_i32_1 = arith.constant 0 : i32
    return %arg0, %c0_i32, %c0_i32_0 : i32, i32, i32
  }
  func.func @transform_3(%arg0: i32, %arg1: i32) -> (i32, i32) {
    %c0_i32 = arith.constant 0 : i32
    %c0_i32_0 = arith.constant 0 : i32
    %c0_i32_1 = arith.constant 0 : i32
    return %c0_i32, %c0_i32_0 : i32, i32
  }
  func.func @transform_4(%arg0: i32, %arg1: i32) -> (i32, i32) {
    %c0_i32 = arith.constant 0 : i32
    %c0_i32_0 = arith.constant 0 : i32
    %c0_i32_1 = arith.constant 0 : i32
    return %c0_i32, %c0_i32_0 : i32, i32
  }
  func.func @transform_5(%arg0: i32, %arg1: i32) -> (i32, i32) {
    %c0_i32 = arith.constant 0 : i32
    %c0_i32_0 = arith.constant 0 : i32
    %c0_i32_1 = arith.constant 0 : i32
    return %c0_i32, %c0_i32_0 : i32, i32
  }
  func.func @transform_6(%arg0: i32, %arg1: i32) -> (i32, i32, i32) {
    %c0_i32 = arith.constant 0 : i32
    %c0_i32_0 = arith.constant 0 : i32
    return %arg0, %c0_i32, %arg1 : i32, i32, i32
  }
}

</mosaic_0001>

<bundles_post_ra>
// kernel: tpu_custom_call.1
= control target key start
LH: loop header
LB: loop body
LE: loop exit
PB: predicated region body
PF: predicated region fallthrough
CT: control target
= control target key end

     0   :  { %s4540_s0 = inlined_call_operand.hbm [shape: f32[2,16,128], index: 0, kind: input, shape index: {}]   ;;  %s4541_s1 = inlined_call_operand.hbm [shape: f32[2,16,128], index: 1, kind: input, shape index: {}]   ;;  %s4542_s2 = inlined_call_operand.vmem [shape: bf16[2,16,128], index: 2, kind: input, shape index: {}]   ;;  %s4543_s3 = inlined_call_operand.hbm [shape: f32[8,8], index: 3, kind: input, shape index: {}]   ;;  %s4544_s4 = inlined_call_operand.vmem [shape: f32[8,8], index: 4, kind: input, shape index: {}]   ;;  %s4545_s5 = inlined_call_operand.vmem [shape: f32[8,1], index: 5, kind: input, shape index: {}]   ;;  %s4546_s6 = inlined_call_operand.hbm [shape: f32[2,8,128], index: 6, kind: output, shape index: {}]  }
   0x1   :  { %4554 = sst [smem:[#allocation15_spill]] %s4540_s0 }
   0x2   :  { %4555 = sst [smem:[#allocation16_spill]] %s4543_s3 }
   0x3   :  { %11 = vsyncpa [#allocation3], 0 }
   0x4   :  { %13 = vsyncpa [#allocation3 + $0x1], 0 }
   0x5   :  { %14 = vsyncpa [#allocation6], 0 }
   0x6   :  { %16 = vsyncpa [#allocation6 + $0x1], 0 }
   0x7   :  { %17 = vsyncpa [#allocation4], 0 }
   0x8   :  { %19 = vsyncpa [#allocation4 + $0x1], 0  ;;  %s2950_s21 = smov 0   ;;  %s2952_s22 = smov 0  }
   0x9   :  { %s2954_s23 = smov 0   ;;  %s2956_s24 = smov 0  }
   0xa   :  { %s2958_s4 = smov 0   ;;  %s2960_s25 = smov 0  }
   0xb LB: > { %4556 = sst [smem:[#allocation13_spill]] %s2899_s4  ;;  %s2981_s26 = sadd.s32 4294967295, %s2903_s25   ;;  %s2903_s25 = sphi %s2960_s25, %s25_s25   ;;  %s2899_s4 = sphi %s2958_s4, %s4580_s4   ;;  %s2895_s24 = sphi %s2956_s24, %s4579_s24   ;;  %s2891_s23 = sphi %s2954_s23, %s4583_s23   ;;  %s2887_s22 = sphi %s2952_s22, %s4582_s22   ;;  %s2883_s21 = sphi %s2950_s21, %s4581_s21  }
   0xc   : > { %s2358_s27 = sadd.s32 4294967294, %s2903_s25   ;;  %p4548_p0 = scmp.ne.s32.totalorder %s2891_s23, %s2887_s22 }
   0xd   : > { %p59_p1 = scmp.ne.s32.totalorder %s2887_s22, %s2883_s21  ;;  %p4547_p2 = scmp.eq.s32.totalorder %s2981_s26, 0 }
   0xe   : > { %p200_p3 = scmp.eq.s32.totalorder %s2981_s26, 1  ;;  %p206_p4 = scmp.eq.s32.totalorder %s2358_s27, 1 }
   0xf   : > { %p2359_p5 = scmp.ge.s32.totalorder %s2903_s25, 1  ;;  %p2993_p6 = por %p4547_p2, %p59_p1 }
  0x10   : > { %p3000_p7 = por %p200_p3, %p4548_p0  ;;  %p3004_p8 = por %p206_p4, %p59_p1 }
  0x11   : > { %s4557_s28 = scalar_select %p2993_p6, 1, 0 }
  0x12   : > { %s4558_s29 = scalar_select %p3000_p7, 1, 0 }
  0x13   : > { %s4559_s30 = scalar_select %p3004_p8, 1, 0 }
  0x14   : > { %p213_p9 = scmp.lt.s32.totalorder %s2903_s25, 3  ;;  %s2905_s8 = smov [#allocation7]  }
  0x15   : > { %s226_s9 = sshll.u32 %s2905_s8, 4  ;;  %s46_s10 = sadd.s32 1, %s2891_s23  ;;  %s227_s9 = int_to_ptr.vmem [resolvable:$true] %s226_s9 }
  0x16   : > { %p3009_p10 = pnand %p2359_p5, %p213_p9  ;;  %s37_s12 = sadd.s32 1, %s2899_s4 }
  0x17   : > { %p3024_p1 = scmp.ge.s32.totalorder %s37_s12, 2  ;;  %s4563_s3 = sld [smem:[#allocation16_spill]] }
  0x18   : > { %s4560_s7 = scalar_select %p3009_p10, 1, 0 }
  0x19   : > { %p2647_p12 = pneg %p3009_p10 }
  0x1a   : > { %s4562_s13 = scalar_select %p3024_p1, 1, 0 }
  0x1b   : > { %p3019_p13 = pnand %p2647_p12, %p4547_p2 }
  0x1d   : > { %s2725_s16 = scalar_lea.hbm %s4563_s3, 128  ;;  %p2727_p9 = pneg %p3019_p13 }
  0x1e   : > { %p2726_p5 = scmp.ne.s32.totalorder %s4563_s3, %s2725_s16  ;;  %p2732_p2 = scmp.lt.u32.totalorder %s2725_s16, %s4563_s3 }
  0x20   : > { %p2728_p12 = pnand %p2727_p9, %p2726_p5 }
  0x22   : > { %p2729_p11 = pneg %p2728_p12 }
  0x24   : > { %p2734_p0 = pnand %p2732_p2, %p2729_p11 }
  0x26   : > { %2737 = shalt.err (!%p2734_p0)
}
  0x27   : > { %s2738_s27 = scalar_lea.vmem %s227_s9, 128  ;;  %p2746_p7 = scmp.lt.s32.totalorder %s227_s9, %s227_s9 }
  0x28   : > { %p2739_p4 = scmp.ne.s32.totalorder %s227_s9, %s2738_s27  ;;  %p2747_p6 = scmp.lt.s32.totalorder %s2738_s27, %s2738_s27 }
  0x2a   : > { %p2741_p3 = pnand %p2739_p4, %p2727_p9  ;;  %p2748_p10 = por %p2747_p6, %p2746_p7 }
  0x2c   : > { %p2742_p8 = pneg %p2741_p3 }
  0x2e   : > { %p2749_p1 = pnand %p2748_p10, %p2742_p8 }
  0x30   : > { %2752 = shalt.err (!%p2749_p1)
}
  0x31   : > { %2650 = dma.hbm_to_vmem [thread:$0]  (!%p3019_p13), %s4563_s3, 128, %s227_s9, [#allocation6]  }
  0x32   : > { %p4564_p0 = scmp.ne.s32.totalorder %s4562_s13, 0  ;;  %p4566_p2 = scmp.ne.s32.totalorder %s2891_s23, %s2887_s22 }
  0x33   : > { %p4567_p6 = scmp.eq.s32.totalorder %s2903_s25, 0  ;;  %s3056_s11 = sand.u32 1, %s2891_s23  }
  0x34   : > { %s4585_s12 = smov (%p4564_p0, %s37_s12), 0  ;;  %s2362_s16 = sshll.u32 %s3056_s11, 3 }
  0x35   : > { %4565 = sst [smem:[#allocation14_spill]] %s4585_s12  ;;  %p55_p7 = por %p4567_p6, %p4566_p2 }
  0x36   : > { %s41_s15 = ssub.s32 %s2899_s4, %s4585_s12  ;;  %s2461_s17 = sshll.u32 %s2899_s4, 8 }
  0x37   : > { %p44_p8 = scmp.eq.s32.totalorder %s41_s15, 0  ;;  %s4568_s0 = sld [smem:[#allocation15_spill]] }
  0x38   : > { %s247_s20 = scalar_lea.vmem [#allocation2], %s2362_s16  ;;  %p4569_p10 = scmp.lt.s32.totalorder %s2903_s25, 2 }
  0x39   : > { %s3065_s18 = scalar_select %p44_p8, %s2891_s23, %s46_s10  }
  0x3a   : > { %s256_s27 = sshll.u32 %s247_s20, 4  ;;  %p3076_p11 = pnand %p4569_p10, %p55_p7  ;;  %s3072_s27 = int_to_ptr.vmem [resolvable:$true] %s256_s27 }
  0x3b   : > { %s3084_s9 = scalar_lea.hbm %s4541_s1, %s2461_s17  ;;  %s244_s13 = scalar_lea.sflag [#allocation3], %s3056_s11 }
  0x3c   : > { %p2755_p1 = pneg %p3076_p11 }
  0x3d   : > { %s3070_s19 = scalar_lea.hbm %s4568_s0, %s2461_s17  ;;  %s2758_s12 = scalar_lea.hbm %s4568_s0, 512 }
  0x3e   : > { %s2753_s3 = scalar_lea.hbm %s3070_s19, 128  ;;  %p2759_p5 = scmp.lt.u32.totalorder %s3070_s19, %s4568_s0 }
  0x3f   : > { %p2754_p13 = scmp.ne.s32.totalorder %s3070_s19, %s2753_s3  ;;  %p2760_p9 = scmp.lt.u32.totalorder %s2758_s12, %s2753_s3 }
  0x40   : > { %p2762_p0 = scmp.lt.u32.totalorder %s2753_s3, %s3070_s19 }
  0x41   : > { %p2756_p3 = pnand %p2755_p1, %p2754_p13  ;;  %p2761_p12 = por %p2760_p9, %p2759_p5 }
  0x43   : > { %p2757_p4 = pneg %p2756_p3  ;;  %p2763_p2 = por %p2762_p0, %p2761_p12 }
  0x45   : > { %p2764_p6 = pnand %p2763_p2, %p2757_p4 }
  0x47   : > { %2767 = shalt.err (!%p2764_p6)
}
  0x48   : > { %s2768_s17 = scalar_lea.vmem %s3072_s27, 128  ;;  %s2906_s14 = smov [#allocation2]  }
  0x49   : > { %p2769_p7 = scmp.ne.s32.totalorder %s3072_s27, %s2768_s17  ;;  %s2773_s15 = sshll.u32 %s2906_s14, 4  ;;  %s2774_s15 = int_to_ptr.vmem [resolvable:$false] %s2773_s15 }
  0x4a   : > { %s2775_s4 = scalar_lea.vmem %s2774_s15, 256  ;;  %p2776_p13 = scmp.lt.s32.totalorder %s3072_s27, %s2774_s15 }
  0x4b   : > { %p2771_p8 = pnand %p2769_p7, %p2755_p1  ;;  %p2777_p3 = scmp.lt.s32.totalorder %s2775_s4, %s2768_s17 }
  0x4d   : > { %p2772_p10 = pneg %p2771_p8  ;;  %p2778_p5 = por %p2777_p3, %p2776_p13 }
  0x4f   : > { %p2779_p9 = pnand %p2778_p5, %p2772_p10 }
  0x51   : > { %2782 = shalt.err (!%p2779_p9)
}
  0x52   : > { %2654 = dma.hbm_to_vmem [thread:$0]  (!%p3076_p11), %s3070_s19, 128, %s3072_s27, %s244_s13  }
  0x53   : > { %s4571_s3 = sshll.u32 %s3056_s11, 4  ;;  %s263_s16 = sand.u32 1, %s2903_s25  }
  0x54   : > { %s267_s12 = scalar_lea.vmem [#allocation5], %s4571_s3  ;;  %s3117_s20 = scalar_lea.sflag [#allocation6], %s263_s16 }
  0x55   : > { %s274_s10 = sshll.u32 %s267_s12, 4  ;;  %s2783_s17 = scalar_lea.hbm %s3084_s9, 256  ;;  %s3115_s10 = int_to_ptr.vmem [resolvable:$true] %s274_s10 }
  0x56   : > { %p2784_p4 = scmp.ne.s32.totalorder %s3084_s9, %s2783_s17  ;;  %s2788_s4 = scalar_lea.hbm %s4541_s1, 512 }
  0x57   : > { %p2789_p2 = scmp.lt.u32.totalorder %s3084_s9, %s4541_s1  ;;  %p2790_p6 = scmp.lt.u32.totalorder %s2788_s4, %s2783_s17 }
  0x58   : > { %p2786_p12 = pnand %p2784_p4, %p2755_p1  ;;  %p2792_p8 = scmp.lt.u32.totalorder %s2783_s17, %s3084_s9 }
  0x59   : > { %p2791_p7 = por %p2790_p6, %p2789_p2 }
  0x5a   : > { %p2787_p0 = pneg %p2786_p12 }
  0x5b   : > { %p2793_p10 = por %p2792_p8, %p2791_p7 }
  0x5d   : > { %p2794_p13 = pnand %p2793_p10, %p2787_p0 }
  0x5f   : > { %2797 = shalt.err (!%p2794_p13)
}
  0x60   : > { %s2798_s11 = scalar_lea.vmem %s3115_s10, 256  ;;  %s2907_s27 = smov [#allocation5]  }
  0x61   : > { %p2799_p3 = scmp.ne.s32.totalorder %s3115_s10, %s2798_s11  ;;  %s2803_s13 = sshll.u32 %s2907_s27, 4  ;;  %s2804_s13 = int_to_ptr.vmem [resolvable:$false] %s2803_s13 }
  0x62   : > { %s2805_s0 = scalar_lea.vmem %s2804_s13, 512  ;;  %p2806_p4 = scmp.lt.s32.totalorder %s3115_s10, %s2804_s13 }
  0x63   : > { %p2801_p5 = pnand %p2799_p3, %p2755_p1  ;;  %p2807_p12 = scmp.lt.s32.totalorder %s2805_s0, %s2798_s11 }
  0x65   : > { %p2802_p9 = pneg %p2801_p5  ;;  %p2808_p2 = por %p2807_p12, %p2806_p4 }
  0x67   : > { %p2809_p6 = pnand %p2808_p2, %p2802_p9 }
  0x69   : > { %2812 = shalt.err (!%p2809_p6)
}
  0x6a   : > { %s2908_s3 = smov 128   ;;  %s2909_s12 = smov 8  }
  0x6b   : > { %2657 = dma.hbm_to_vmem [thread:$0]  (!%p3076_p11), %s3084_s9, 256, %s3115_s10, %s3117_s20, %s2908_s3, %s2908_s3, %s2909_s12  }
  0x6c   : > { %p4572_p1 = scmp.ne.s32.totalorder %s4560_s7, 0 }
  0x6d   : > { %s3146_s16 = sand.u32 (!%p4572_p1), 1, %s2887_s22   ;;  %p4573_p0 = scmp.ne.s32.totalorder (!%p4572_p1), %s4557_s28, 0 }
  0x6e   : > { %294 = sbr.rel (%p4572_p1) target bundleno = 2540 (0x9ec), region = 44  ;;  %s2369_s17 = sshll.u32 (!%p4572_p1), %s3146_s16, 3 }
  0x6f   : > { %s297_s14 = scalar_lea.sflag (!%p4572_p1), [#allocation3], %s3146_s16  ;;  %s300_s15 = scalar_lea.vmem (!%p4572_p1), [#allocation2], %s2369_s17 }
  0x75   : > { %2866 = dma.done.wait (%p4573_p0), %s297_s14, 128  }
  0x76   : > { %2868 = vsyncadd (%p4573_p0), %s297_s14, 4294967168  ;;  %s305_s7 = sand.u32 1, %s2981_s26   ;;  %s2370_s8 = sshll.u32 %s3146_s16, 4 }
  0x77   : > { %s306_s9 = scalar_lea.sflag [#allocation6], %s305_s7  ;;  %s309_s10 = scalar_lea.vmem [#allocation5], %s2370_s8 }
  0x78   : > { %2870 = dma.done.wait (%p4573_p0), %s306_s9, 256  }
  0x79   : > { %2872 = vsyncadd (%p4573_p0), %s306_s9, 4294967040  ;;  %p4574_p11 = scmp.eq.s32.totalorder %s2981_s26, 0 }
  0x7b   : > { %2874 = dma.done.wait (%p4574_p11), [#allocation6], 128   ;;  %p4575_p7 = pmov %p4574_p11 }
  0x7c   : > { %v363_v0 = vlaneseq  ;;  %v2910_v1 = vmov 0.0   ;;  %v358_v3 = vld [vmem:[%s300_s15] sm:$0xff]  ;;  %v359_v5 = vld [vmem:[%s309_s10] sm:$0xff]  ;;  %vm400_vm1 = vcmask 130048   ;;  %p352_p8 = scmp.lt.s32.totalorder %s2895_s24, 1  ;;  %s2458_s13 = sshll.u32 %s2895_s24, 7 }
  0x7d   : > { %2876 = vsyncadd (%p4575_p7), [#allocation6], 4294967168  ;;  %2548 = vmatprep.subr.mxu1 %v2910_v1  ;;  %v367_v4 = vmul.f32 -2.0, %v358_v3  ;;  %v360_v6 = vld [vmem:[%s309_s10 + $0x8] sm:$0xff]  ;;  %s351_s0 = scalar_lea.vmem [#allocation8], %s2369_s17  ;;  %s4491_s15 = scalar_lea.hbm %s4546_s6, %s2458_s13 }
  0x7e   : > { %v364_v2 = vshrl.u32 %v363_v0, 7  ;;  %2549 = vmatpush3.msra.mxu1 %v358_v3  ;;  %v2633_v7 = vpack.c.bf16 %v360_v6, %v359_v5  ;;  %v3236_v42 = vand.u32 127, %v363_v0  ;;  %s353_s26 = scalar_select %p352_p8, %s2895_s24, 1 }
  0x7f   : > { %2553 = vmatprep.subr.bf16.mxu1 %v2910_v1  ;;  %368 = vxpose.xlu0.b32.start [1/2] (short) %v367_v4, 128  ;;  %s2232_s3 = sshll.u32 %s351_s0, 4  ;;  %s2218_s7 = scalar_lea.sflag [#allocation4], %s3146_s16  ;;  %s4493_s3 = int_to_ptr.vmem [resolvable:$true] %s2232_s3 }
  0x80   : > { %vm365_vm0 = vcmp.eq.s32.totalorder %v364_v2, 0  ;;  %2634 = vmatprep.subr.bf16.mxu0 %v2633_v7  ;;  %s2463_s28 = sshll.u32 %s353_s26, 3  ;;  %s2813_s8 = scalar_lea.vmem %s4493_s3, 128 }
  0x81   : > { %v366_v8 = vsel %vm365_vm0, 1.0, %v2910_v1  ;;  %2636 = vmatpush3.bf16.msra.mxu0 %v2633_v7  ;;  %s4053_s19 = scalar_lea.vmem %s4542_s2, %s2463_s28  ;;  %p2814_p10 = scmp.ne.s32.totalorder %s4493_s3, %s2813_s8 }
  0x82   : > { %2573 = vmatprep.subr.bf16.mxu0 %v2910_v1  ;;  %p4576_p13 = scmp.ne.s32.totalorder %s4558_s29, 0  ;;  %s2914_s24 = smov [#allocation8]  }
  0x83   : > { %369 = vxpose.xlu0.b32.end [2/2] (short) %v366_v8, 128  ;;  %s2817_s17 = sshll.u32 %s2914_s24, 4  ;;  %s2818_s17 = int_to_ptr.vmem [resolvable:$false] %s2817_s17 }
  0x84   : > { %p2815_p3 = pnand %p2814_p10, %p4576_p13  ;;  %s2819_s9 = scalar_lea.vmem %s2818_s17, 256 }
  0x85   : > { %p2820_p9 = scmp.lt.s32.totalorder %s4493_s3, %s2818_s17  ;;  %p2821_p4 = scmp.lt.s32.totalorder %s2819_s9, %s2813_s8 }
  0x86   : > { %p2816_p5 = pneg %p2815_p3 }
  0x87   : > { %p2822_p12 = por %p2821_p4, %p2820_p9 }
  0x89   : > { %p2823_p2 = pnand %p2822_p12, %p2816_p5 }
  0xff   : > { %v384_v9 = vpop.trf.xlu0 }
 0x100   : > { %2524 = vmatprep.mubr.msk.f32.mxu0 %vm400_vm1, %v384_v9 }
 0x103   : > { %v385_v10 = vpop.trf.xlu0 }
 0x104   : > { %2525 = vmatmul.mubr.msk.f32.vlgmr.msra.gmra.mrb[0].mxu0 %vm400_vm1, %v385_v10 }
 0x107   : > { %v386_v11 = vpop.trf.xlu0 }
 0x108   : > { %2527 = vmatprep.mubr.msk.f32.mxu0 %vm400_vm1, %v386_v11 }
 0x10b   : > { %v387_v12 = vpop.trf.xlu0 }
 0x10c   : > { %2528 = vmatmul.mubr.msk.f32.gmra.mrb[2].mxu0 %vm400_vm1, %v387_v12 }
 0x10f   : > { %v388_v13 = vpop.trf.xlu0 }
 0x110   : > { %2530 = vmatprep.mubr.msk.f32.mxu0 %vm400_vm1, %v388_v13 }
 0x113   : > { %v389_v14 = vpop.trf.xlu0 }
 0x114   : > { %2531 = vmatmul.mubr.msk.f32.gmra.mrb[4].mxu0 %vm400_vm1, %v389_v14 }
 0x117   : > { %v390_v15 = vpop.trf.xlu0 }
 0x118   : > { %2533 = vmatprep.mubr.msk.f32.mxu0 %vm400_vm1, %v390_v15 }
 0x11b   : > { %v391_v16 = vpop.trf.xlu0 }
 0x11c   : > { %2534 = vmatmul.mubr.msk.f32.gmra.mrb[6].mxu0 %vm400_vm1, %v391_v16 }
 0x11f   : > { %v392_v17 = vpop.trf.xlu0 }
 0x120   : > { %2536 = vmatprep.mubr.msk.f32.mxu0 %vm400_vm1, %v392_v17 }
 0x123   : > { %v393_v18 = vpop.trf.xlu0 }
 0x124   : > { %2537 = vmatmul.mubr.msk.f32.gmra.mrb[8].mxu0 %vm400_vm1, %v393_v18 }
 0x127   : > { %v394_v19 = vpop.trf.xlu0 }
 0x128   : > { %2539 = vmatprep.mubr.msk.f32.mxu0 %vm400_vm1, %v394_v19 }
 0x12b   : > { %v395_v20 = vpop.trf.xlu0 }
 0x12c   : > { %2540 = vmatmul.mubr.msk.f32.gmra.mrb[10].mxu0 %vm400_vm1, %v395_v20 }
 0x12f   : > { %v396_v21 = vpop.trf.xlu0 }
 0x130   : > { %2542 = vmatprep.mubr.msk.f32.mxu0 %vm400_vm1, %v396_v21 }
 0x133   : > { %v397_v22 = vpop.trf.xlu0 }
 0x134   : > { %2543 = vmatmul.mubr.msk.f32.gmra.mrb[12].mxu0 %vm400_vm1, %v397_v22 }
 0x137   : > { %v398_v23 = vpop.trf.xlu0 }
 0x138   : > { %2545 = vmatprep.mubr.msk.f32.mxu0 %vm400_vm1, %v398_v23 }
 0x13b   : > { %v399_v24 = vpop.trf.xlu0 }
 0x13c   : > { %2546 = vmatmul.mubr.msk.f32.gmra.mrb[14].mxu0 %vm400_vm1, %v399_v24 }
 0x1d7   : > { %v3187_v25 = vpop.f32.mrb[0].mxu0 }
 0x1d8   : > { %v3189_v26 = vpop.f32.mrb[1].mxu0 }
 0x1d9   : > { %677 = vmin.xlane.f32.xlu1 %v3189_v26 }
 0x1dd   : > { %679 = vmin.xlane.f32.xlu1 %v3187_v25 }
 0x1df   : > { %v3193_v27 = vpop.f32.mrb[2].mxu0 }
 0x1e0   : > { %v3195_v28 = vpop.f32.mrb[3].mxu0 }
 0x1e1   : > { %683 = vmin.xlane.f32.xlu1 %v3193_v27  ;;  %681 = vmin.xlane.f32.xlu0 %v3195_v28 }
 0x1e7   : > { %v3199_v29 = vpop.f32.mrb[4].mxu0 }
 0x1e8   : > { %687 = vmin.xlane.f32.xlu1 %v3199_v29  ;;  %v3202_v30 = vpop.f32.mrb[5].mxu0 }
 0x1ec   : > { %685 = vmin.xlane.f32.xlu1 %v3202_v30 }
 0x1ef   : > { %v3205_v31 = vpop.f32.mrb[6].mxu0 }
 0x1f0   : > { %691 = vmin.xlane.f32.xlu1 %v3205_v31  ;;  %v3208_v32 = vpop.f32.mrb[7].mxu0 }
 0x1f4   : > { %689 = vmin.xlane.f32.xlu1 %v3208_v32 }
 0x1f7   : > { %v3211_v33 = vpop.f32.mrb[8].mxu0 }
 0x1f8   : > { %695 = vmin.xlane.f32.xlu1 %v3211_v33  ;;  %v3214_v34 = vpop.f32.mrb[9].mxu0 }
 0x1fc   : > { %693 = vmin.xlane.f32.xlu1 %v3214_v34 }
 0x1ff   : > { %v3217_v35 = vpop.f32.mrb[10].mxu0 }
 0x200   : > { %699 = vmin.xlane.f32.xlu1 %v3217_v35  ;;  %v3220_v36 = vpop.f32.mrb[11].mxu0 }
 0x204   : > { %697 = vmin.xlane.f32.xlu1 %v3220_v36 }
 0x207   : > { %v3223_v37 = vpop.f32.mrb[12].mxu0 }
 0x208   : > { %703 = vmin.xlane.f32.xlu1 %v3223_v37  ;;  %v3226_v38 = vpop.f32.mrb[13].mxu0 }
 0x20c   : > { %701 = vmin.xlane.f32.xlu1 %v3226_v38 }
 0x20f   : > { %v3229_v39 = vpop.f32.mrb[14].mxu0 }
 0x210   : > { %v3231_v40 = vpop.f32.mrb[15].mxu0 }
 0x211   : > { %705 = vmin.xlane.f32.xlu1 %v3231_v40 }
 0x215   : > { %707 = vmin.xlane.f32.xlu1 %v3229_v39 }
 0x266   : > { %v678_v41 = vpop.xlane.xlu1 %677 }
 0x267   : > { %vm709_vm2 = vcmp.le.f32.partialorder %v3189_v26, %v678_v41 }
 0x268   : > { %v3241_v44 = vsel %vm709_vm2, %v3236_v42, 128 }
 0x269   : > { %v742_v50 = vshra.s32 %v3241_v44, 16 }
 0x26a   : > { %v680_v43 = vpop.xlane.xlu1 %679 }
 0x26b   : > { %vm710_vm3 = vcmp.le.f32.partialorder %v3187_v25, %v680_v43  ;;  %v3256_v52 = vcvt.s32.f32 %v742_v50 }
 0x26c   : > { %v3244_v45 = vsel %vm710_vm3, %v3236_v42, 128 }
 0x26d   : > { %v756_v46 = vshra.s32 %v3244_v45, 16 }
 0x26e   : > { %v684_v47 = vpop.xlane.xlu1 %683  ;;  %v682_v48 = vpop.xlane.xlu0 %681 }
 0x26f   : > { %vm712_vm4 = vcmp.le.f32.partialorder %v3193_v27, %v684_v47  ;;  %v3248_v49 = vcvt.s32.f32 %v756_v46  ;;  %vm711_vm5 = vcmp.le.f32.partialorder %v3195_v28, %v682_v48 }
 0x270   : > { %v3252_v51 = vsel %vm712_vm4, %v3236_v42, 128  ;;  %v3260_v54 = vsel %vm711_vm5, %v3236_v42, 128 }
 0x271   : > { %759 = vmin.xlane.f32.xlu1 %v3248_v49  ;;  %v784_v53 = vshra.s32 %v3252_v51, 16  ;;  %v770_v57 = vshra.s32 %v3260_v54, 16 }
 0x273   : > { %v3264_v56 = vcvt.s32.f32 %v784_v53  ;;  %v3272_v60 = vcvt.s32.f32 %v770_v57 }
 0x275   : > { %v688_v55 = vpop.xlane.xlu1 %687  ;;  %745 = vmin.xlane.f32.xlu1 %v3256_v52 }
 0x276   : > { %vm714_vm6 = vcmp.le.f32.partialorder %v3199_v29, %v688_v55 }
 0x277   : > { %v3268_v58 = vsel %vm714_vm6, %v3236_v42, 128 }
 0x278   : > { %v812_v61 = vshra.s32 %v3268_v58, 16 }
 0x279   : > { %v686_v59 = vpop.xlane.xlu1 %685  ;;  %787 = vmin.xlane.f32.xlu1 %v3264_v56 }
 0x27a   : > { %vm713_vm7 = vcmp.le.f32.partialorder %v3202_v30, %v686_v59  ;;  %v3280_v0 = vcvt.s32.f32 %v812_v61 }
 0x27b   : > { %v3276_v62 = vsel %vm713_vm7, %v3236_v42, 128 }
 0x27c   : > { %v798_v2 = vshra.s32 %v3276_v62, 16 }
 0x27d   : > { %v692_v63 = vpop.xlane.xlu1 %691  ;;  %773 = vmin.xlane.f32.xlu1 %v3272_v60 }
 0x27e   : > { %vm716_vm8 = vcmp.le.f32.partialorder %v3205_v31, %v692_v63  ;;  %v3288_v5 = vcvt.s32.f32 %v798_v2 }
 0x27f   : > { %v3284_v3 = vsel %vm716_vm8, %v3236_v42, 128 }
 0x280   : > { %v840_v6 = vshra.s32 %v3284_v3, 16 }
 0x281   : > { %v690_v4 = vpop.xlane.xlu1 %689  ;;  %815 = vmin.xlane.f32.xlu1 %v3280_v0 }
 0x282   : > { %vm715_vm9 = vcmp.le.f32.partialorder %v3208_v32, %v690_v4  ;;  %v3296_v9 = vcvt.s32.f32 %v840_v6 }
 0x283   : > { %v3292_v7 = vsel %vm715_vm9, %v3236_v42, 128  ;;  %vm2911_vm9 = vmmov 0  }
 0x284   : > { %v826_v10 = vshra.s32 %v3292_v7, 16  ;;  %2550 = vmatprep.mubr.msk.f32.mxu1 %vm2911_vm9, %v2910_v1  ;;  %2589 = vmatprep.mubr.msk.bf16.mxu0 %vm2911_vm9, %v2910_v1 }
 0x285   : > { %v696_v8 = vpop.xlane.xlu1 %695  ;;  %801 = vmin.xlane.f32.xlu1 %v3288_v5 }
 0x286   : > { %vm718_vm10 = vcmp.le.f32.partialorder %v3211_v33, %v696_v8  ;;  %v3304_v13 = vcvt.s32.f32 %v826_v10 }
 0x287   : > { %v3300_v11 = vsel %vm718_vm10, %v3236_v42, 128  ;;  %vm601_vm10 = vcmask 64512  }
 0x288   : > { %v868_v14 = vshra.s32 %v3300_v11, 16 }
 0x289   : > { %v694_v12 = vpop.xlane.xlu1 %693  ;;  %843 = vmin.xlane.f32.xlu1 %v3296_v9 }
 0x28a   : > { %vm717_vm11 = vcmp.le.f32.partialorder %v3214_v34, %v694_v12  ;;  %v3311_v17 = vcvt.s32.f32 %v868_v14  ;;  %v755_v14 = vand.u32 65535, %v3244_v45 }
 0x28b   : > { %v3308_v15 = vsel %vm717_vm11, %v3236_v42, 128 }
 0x28c   : > { %v854_v18 = vshra.s32 %v3308_v15, 16 }
 0x28d   : > { %v700_v16 = vpop.xlane.xlu1 %699  ;;  %829 = vmin.xlane.f32.xlu1 %v3304_v13 }
 0x28e   : > { %vm720_vm12 = vcmp.le.f32.partialorder %v3217_v35, %v700_v16  ;;  %v3320_v21 = vcvt.s32.f32 %v854_v18  ;;  %v757_v18 = vcvt.s32.f32 %v755_v14 }
 0x28f   : > { %v3323_v22 = vsel %vm720_vm12, %v3236_v42, 128 }
 0x290   : > { %v896_v46 = vshra.s32 %v3323_v22, 16 }
 0x291   : > { %v698_v19 = vpop.xlane.xlu1 %697  ;;  %871 = vmin.xlane.f32.xlu1 %v3311_v17 }
 0x292   : > { %vm719_vm13 = vcmp.le.f32.partialorder %v3220_v36, %v698_v19  ;;  %v3342_v55 = vcvt.s32.f32 %v896_v46  ;;  %v741_v19 = vand.u32 65535, %v3241_v44  ;;  %v769_v44 = vand.u32 65535, %v3260_v54 }
 0x293   : > { %v3318_v20 = vsel %vm719_vm13, %v3236_v42, 128  ;;  %v797_v54 = vand.u32 65535, %v3276_v62  ;;  %v825_v62 = vand.u32 65535, %v3292_v7  ;;  %v867_v7 = vand.u32 65535, %v3300_v11 }
 0x294   : > { %v882_v23 = vshra.s32 %v3318_v20, 16  ;;  %v743_v46 = vcvt.s32.f32 %v741_v19 }
 0x295   : > { %v704_v24 = vpop.xlane.xlu1 %703  ;;  %857 = vmin.xlane.f32.xlu1 %v3320_v21 }
 0x296   : > { %vm722_vm14 = vcmp.le.f32.partialorder %v3223_v37, %v704_v24  ;;  %v3328_v41 = vcvt.s32.f32 %v882_v23 }
 0x297   : > { %v3331_v43 = vsel %vm722_vm14, %v3236_v42, 128 }
 0x298   : > { %v924_v47 = vshra.s32 %v3331_v43, 16 }
 0x299   : > { %v702_v48 = vpop.xlane.xlu1 %701  ;;  %885 = vmin.xlane.f32.xlu1 %v3328_v41 }
 0x29a   : > { %vm721_vm15 = vcmp.le.f32.partialorder %v3226_v38, %v702_v48  ;;  %v3337_v50 = vcvt.s32.f32 %v924_v47  ;;  %v783_v47 = vand.u32 65535, %v3252_v51  ;;  %v811_v51 = vand.u32 65535, %v3268_v58 }
 0x29b   : > { %v3340_v53 = vsel %vm721_vm15, %v3236_v42, 128  ;;  %v839_v58 = vand.u32 65535, %v3284_v3 }
 0x29c   : > { %927 = vmin.xlane.f32.xlu0 %v3337_v50  ;;  %v910_v57 = vshra.s32 %v3340_v53, 16 }
 0x29d   : > { %899 = vmin.xlane.f32.xlu1 %v3342_v55 }
 0x29e   : > { %v706_v59 = vpop.xlane.xlu1 %705  ;;  %v3347_v61 = vcvt.s32.f32 %v910_v57  ;;  %v785_v57 = vcvt.s32.f32 %v783_v47 }
 0x29f   : > { %vm723_vm0 = vcmp.le.f32.partialorder %v3231_v40, %v706_v59 }
 0x2a0   : > { %v3351_v63 = vsel %vm723_vm0, %v3236_v42, 128 }
 0x2a1   : > { %913 = vmin.xlane.f32.xlu1 %v3347_v61  ;;  %v938_v2 = vshra.s32 %v3351_v63, 16 }
 0x2a2   : > { %v708_v4 = vpop.xlane.xlu1 %707 }
 0x2a3   : > { %vm724_vm1 = vcmp.le.f32.partialorder %v3229_v39, %v708_v4  ;;  %v3356_v6 = vcvt.s32.f32 %v938_v2  ;;  %v771_v2 = vcvt.s32.f32 %v769_v44 }
 0x2a4   : > { %v3359_v8 = vsel %vm724_vm1, %v3236_v42, 128 }
 0x2a5   : > { %941 = vmin.xlane.f32.xlu1 %v3356_v6  ;;  %v952_v10 = vshra.s32 %v3359_v8, 16 }
 0x2a7   : > { %v3363_v12 = vcvt.s32.f32 %v952_v10  ;;  %v813_v10 = vcvt.s32.f32 %v811_v51 }
 0x2a9   : > { %955 = vmin.xlane.f32.xlu0 %v3363_v12 }
 0x2fe   : > { %v3367_v16 = vpop.xlane.xlu1 %759 }
 0x2ff   : > { %vm761_vm2 = vcmp.eq.f32.partialorder %v3248_v49, %v3367_v16 }
 0x300   : > { %v762_v23 = vsel %vm761_vm2, %v757_v18, inf  ;;  %v799_v18 = vcvt.s32.f32 %v797_v54 }
 0x301   : > { %763 = vmin.xlane.f32.xlu0 %v762_v23  ;;  %v841_v23 = vcvt.s32.f32 %v839_v58 }
 0x302   : > { %v3372_v24 = vpop.xlane.xlu1 %745 }
 0x303   : > { %vm747_vm3 = vcmp.eq.f32.partialorder %v3256_v52, %v3372_v24 }
 0x304   : > { %v748_v48 = vsel %vm747_vm3, %v743_v46, inf  ;;  %v594_v46 = vld [vmem:[#allocation7] sm:$0xff] }
 0x305   : > { %749 = vmin.xlane.f32.xlu1 %v748_v48  ;;  %2551 = vmatmul.mubr.msk.f32.vlgmr.msra.gmra.mrb[0].mxu1 %vm601_vm10, %v594_v46  ;;  %v869_v48 = vcvt.s32.f32 %v867_v7  ;;  %v766_v46 = vcvt.f32.s32 %v3367_v16 }
 0x306   : > { %v3377_v45 = vpop.xlane.xlu1 %787  ;;  %2569 = vmatprep.mubr.msk.bf16.mxu1 %vm2911_vm9, %v2910_v1 }
 0x307   : > { %vm789_vm4 = vcmp.eq.f32.partialorder %v3264_v56, %v3377_v45  ;;  %v767_v7 = vshll.u32 %v766_v46, 16 }
 0x308   : > { %v790_v49 = vsel %vm789_vm4, %v785_v57, inf  ;;  %v853_v57 = vand.u32 65535, %v3308_v15  ;;  %v895_v15 = vand.u32 65535, %v3323_v22 }
 0x309   : > { %791 = vmin.xlane.f32.xlu0 %v790_v49 }
 0x30a   : > { %v3382_v59 = vpop.xlane.xlu1 %773  ;;  %v855_v11 = vcvt.s32.f32 %v853_v57 }
 0x30b   : > { %vm775_vm5 = vcmp.eq.f32.partialorder %v3272_v60, %v3382_v59 }
 0x30c   : > { %v776_v52 = vsel %vm775_vm5, %v771_v2, inf  ;;  %v881_v2 = vand.u32 65535, %v3318_v20  ;;  %v897_v20 = vcvt.s32.f32 %v895_v15 }
 0x30d   : > { %777 = vmin.xlane.f32.xlu1 %v776_v52 }
 0x30e   : > { %v3387_v4 = vpop.xlane.xlu1 %815  ;;  %v883_v52 = vcvt.s32.f32 %v881_v2 }
 0x30f   : > { %vm817_vm6 = vcmp.eq.f32.partialorder %v3280_v0, %v3387_v4 }
 0x310   : > { %v818_v56 = vsel %vm817_vm6, %v813_v10, inf }
 0x311   : > { %819 = vmin.xlane.f32.xlu0 %v818_v56  ;;  %v909_v56 = vand.u32 65535, %v3340_v53 }
 0x312   : > { %v3392_v14 = vpop.xlane.xlu1 %801 }
 0x313   : > { %vm803_vm7 = vcmp.eq.f32.partialorder %v3288_v5, %v3392_v14  ;;  %v827_v5 = vcvt.s32.f32 %v825_v62  ;;  %v951_v62 = vand.u32 65535, %v3359_v8 }
 0x314   : > { %v804_v60 = vsel %vm803_vm7, %v799_v18, inf }
 0x315   : > { %805 = vmin.xlane.f32.xlu1 %v804_v60  ;;  %v937_v60 = vand.u32 65535, %v3351_v63  ;;  %v953_v63 = vcvt.s32.f32 %v951_v62 }
 0x316   : > { %v3397_v19 = vpop.xlane.xlu1 %843 }
 0x317   : > { %vm845_vm8 = vcmp.eq.f32.partialorder %v3296_v9, %v3397_v19 }
 0x318   : > { %v846_v0 = vsel %vm845_vm8, %v841_v23, inf }
 0x319   : > { %847 = vmin.xlane.f32.xlu0 %v846_v0 }
 0x31a   : > { %v3406_v3 = vpop.xlane.xlu1 %829 }
 0x31b   : > { %vm831_vm11 = vcmp.eq.f32.partialorder %v3304_v13, %v3406_v3 }
 0x31c   : > { %v832_v9 = vsel %vm831_vm11, %v827_v5, inf }
 0x31d   : > { %833 = vmin.xlane.f32.xlu1 %v832_v9  ;;  %v752_v9 = vcvt.f32.s32 %v3372_v24 }
 0x31e   : > { %v3413_v47 = vpop.xlane.xlu1 %871 }
 0x31f   : > { %vm873_vm12 = vcmp.eq.f32.partialorder %v3311_v17, %v3413_v47 }
 0x320   : > { %v874_v44 = vsel %vm873_vm12, %v869_v48, inf }
 0x321   : > { %875 = vmin.xlane.f32.xlu0 %v874_v44  ;;  %v794_v44 = vcvt.f32.s32 %v3377_v45 }
 0x322   : > { %v3418_v49 = vpop.xlane.xlu1 %857 }
 0x323   : > { %vm859_vm13 = vcmp.eq.f32.partialorder %v3320_v21, %v3418_v49  ;;  %v923_v21 = vand.u32 65535, %v3331_v43 }
 0x324   : > { %v860_v13 = vsel %vm859_vm13, %v855_v11, inf }
 0x325   : > { %861 = vmin.xlane.f32.xlu1 %v860_v13  ;;  %v925_v58 = vcvt.s32.f32 %v923_v21  ;;  %v795_v13 = vshll.u32 %v794_v44, 16 }
 0x326   : > { %v3423_v51 = vpop.xlane.xlu1 %885 }
 0x327   : > { %vm887_vm14 = vcmp.eq.f32.partialorder %v3328_v41, %v3423_v51  ;;  %v911_v41 = vcvt.s32.f32 %v909_v56  ;;  %v822_v56 = vcvt.f32.s32 %v3387_v4 }
 0x328   : > { %v888_v17 = vsel %vm887_vm14, %v883_v52, inf  ;;  %v780_v52 = vcvt.f32.s32 %v3382_v59 }
 0x329   : > { %889 = vmin.xlane.f32.xlu1 %v888_v17  ;;  %v3428_v10 = vpop.xlane.xlu0 %927  ;;  %v2912_v17 = vmov 1.0|1.0  }
 0x32a   : > { %v3430_v54 = vpop.xlane.xlu1 %899  ;;  %vm929_vm0 = vcmp.eq.f32.partialorder %v3337_v50, %v3428_v10 }
 0x32b   : > { %vm901_vm15 = vcmp.eq.f32.partialorder %v3342_v55, %v3430_v54  ;;  %v930_v23 = vsel %vm929_vm0, %v925_v58, inf  ;;  %v939_v55 = vcvt.s32.f32 %v937_v60  ;;  %v808_v58 = vcvt.f32.s32 %v3392_v14 }
 0x32c   : > { %v902_v18 = vsel %vm901_vm15, %v897_v20, inf  ;;  %v781_v20 = vshll.u32 %v780_v52, 16 }
 0x32d   : > { %903 = vmin.xlane.f32.xlu0 %v902_v18 }
 0x32e   : > { %v3438_v22 = vpop.xlane.xlu1 %913 }
 0x32f   : > { %vm915_vm1 = vcmp.eq.f32.partialorder %v3347_v61, %v3438_v22 }
 0x330   : > { %v916_v53 = vsel %vm915_vm1, %v911_v41, inf  ;;  %v823_v41 = vshll.u32 %v822_v56, 16 }
 0x331   : > { %917 = vmin.xlane.f32.xlu1 %v916_v53  ;;  %931 = vmin.xlane.f32.xlu0 %v930_v23  ;;  %v809_v23 = vshll.u32 %v808_v58, 16 }
 0x332   : > { %v3443_v43 = vpop.xlane.xlu1 %941 }
 0x333   : > { %vm943_vm2 = vcmp.eq.f32.partialorder %v3356_v6, %v3443_v43  ;;  %v753_v6 = vshll.u32 %v752_v9, 16  ;;  %v878_v9 = vcvt.f32.s32 %v3413_v47  ;;  %v948_v58 = vcvt.f32.s32 %v3443_v43 }
 0x334   : > { %v944_v50 = vsel %vm943_vm2, %v939_v55, inf  ;;  %v850_v55 = vcvt.f32.s32 %v3397_v19 }
 0x335   : > { %945 = vmin.xlane.f32.xlu1 %v944_v50 }
 0x336   : > { %v3448_v0 = vpop.xlane.xlu0 %955 }
 0x337   : > { %vm957_vm3 = vcmp.eq.f32.partialorder %v3363_v12, %v3448_v0  ;;  %v962_v43 = vcvt.f32.s32 %v3448_v0 }
 0x338   : > { %v958_v61 = vsel %vm957_vm3, %v953_v63, inf  ;;  %v851_v63 = vshll.u32 %v850_v55, 16 }
 0x339   : > { %959 = vmin.xlane.f32.xlu0 %v958_v61  ;;  %v836_v61 = vcvt.f32.s32 %v3406_v3 }
 0x38e   : > { %v764_v5 = vpop.xlane.xlu0 %763 }
 0x38f   : > { %v765_v8 = vcvt.f32.s32 %v764_v5 }
 0x391   : > { %v768_v48 = vadd.s32 %v767_v7, %v765_v8  ;;  %v837_v7 = vshll.u32 %v836_v61, 16 }
 0x392   : > { %v750_v57 = vpop.xlane.xlu1 %749 }
 0x393   : > { %v751_v11 = vcvt.f32.s32 %v750_v57  ;;  %vm966_vm4 = vcmp.eq.s32.totalorder %v3236_v42, %v768_v48  ;;  %v879_v57 = vshll.u32 %v878_v9, 16 }
 0x394   : > { %v3457_v2 = vsel %vm966_vm4, inf, %v3187_v25 }
 0x395   : > { %v754_v12 = vadd.s32 %v753_v6, %v751_v11  ;;  %1071 = vmin.xlane.f32.xlu0 %v3457_v2  ;;  %v864_v6 = vcvt.f32.s32 %v3418_v49 }
 0x396   : > { %v792_v16 = vpop.xlane.xlu0 %791 }
 0x397   : > { %v793_v24 = vcvt.f32.s32 %v792_v16  ;;  %vm965_vm5 = vcmp.eq.s32.totalorder %v3236_v42, %v754_v12  ;;  %v865_v12 = vshll.u32 %v864_v6, 16  ;;  %v892_v16 = vcvt.f32.s32 %v3423_v51 }
 0x398   : > { %v3463_v15 = vsel %vm965_vm5, inf, %v3189_v26  ;;  %vm2393_vm6 = vmpackc.low %vm966_vm4, %vm965_vm5 }
 0x399   : > { %v796_v45 = vadd.s32 %v795_v13, %v793_v24  ;;  %1069 = vmin.xlane.f32.xlu1 %v3463_v15  ;;  %2554 = vmatpush3.bf16.xpose.msk.msra.mxu1 %vm2393_vm6, %v2912_v17  ;;  %v893_v24 = vshll.u32 %v892_v16, 16 }
 0x39a   : > { %v778_v25 = vpop.xlane.xlu1 %777  ;;  %2555 = vmatprep.subr.bf16.mxu1 %v2910_v1 }
 0x39b   : > { %v779_v59 = vcvt.f32.s32 %v778_v25  ;;  %vm968_vm7 = vcmp.eq.s32.totalorder %v3236_v42, %v796_v45  ;;  %v906_v45 = vcvt.f32.s32 %v3430_v54  ;;  %v920_v54 = vcvt.f32.s32 %v3438_v22 }
 0x39c   : > { %v3471_v21 = vsel %vm968_vm7, inf, %v3193_v27 }
 0x39d   : > { %v782_v26 = vadd.s32 %v781_v20, %v779_v59  ;;  %1075 = vmin.xlane.f32.xlu0 %v3471_v21  ;;  %v907_v59 = vshll.u32 %v906_v45, 16 }
 0x39e   : > { %v820_v18 = vpop.xlane.xlu0 %819 }
 0x39f   : > { %v821_v60 = vcvt.f32.s32 %v820_v18  ;;  %vm967_vm8 = vcmp.eq.s32.totalorder %v3236_v42, %v782_v26 }
 0x3a0   : > { %v3477_v53 = vsel %vm967_vm8, inf, %v3195_v28  ;;  %vm2395_vm10 = vmpackc.low %vm968_vm7, %vm967_vm8 }
 0x3a1   : > { %v824_v4 = vadd.s32 %v823_v41, %v821_v60  ;;  %1073 = vmin.xlane.f32.xlu1 %v3477_v53  ;;  %2556 = vmatpush3.bf16.xpose.msk.msra.mxu1 %vm2395_vm10, %v2912_v17 }
 0x3a2   : > { %v806_v27 = vpop.xlane.xlu1 %805  ;;  %2557 = vmatprep.subr.bf16.mxu1 %v2910_v1 }
 0x3a3   : > { %v807_v62 = vcvt.f32.s32 %v806_v27  ;;  %vm970_vm11 = vcmp.eq.s32.totalorder %v3236_v42, %v824_v4  ;;  %v921_v4 = vshll.u32 %v920_v54, 16 }
 0x3a4   : > { %v3485_v14 = vsel %vm970_vm11, inf, %v3199_v29 }
 0x3a5   : > { %v810_v28 = vadd.s32 %v809_v23, %v807_v62  ;;  %1079 = vmin.xlane.f32.xlu0 %v3485_v14  ;;  %v949_v62 = vshll.u32 %v948_v58, 16 }
 0x3a6   : > { %v848_v50 = vpop.xlane.xlu0 %847 }
 0x3a7   : > { %v849_v46 = vcvt.f32.s32 %v848_v50  ;;  %vm969_vm12 = vcmp.eq.s32.totalorder %v3236_v42, %v810_v28 }
 0x3a8   : > { %v3491_v5 = vsel %vm969_vm12, inf, %v3202_v30  ;;  %vm2397_vm13 = vmpackc.low %vm970_vm11, %vm969_vm12 }
 0x3a9   : > { %v852_v19 = vadd.s32 %v851_v63, %v849_v46  ;;  %1077 = vmin.xlane.f32.xlu1 %v3491_v5  ;;  %2558 = vmatpush3.bf16.xpose.msk.msra.mxu1 %vm2397_vm13, %v2912_v17 }
 0x3aa   : > { %v834_v29 = vpop.xlane.xlu1 %833  ;;  %2559 = vmatprep.subr.bf16.mxu1 %v2910_v1 }
 0x3ab   : > { %v835_v8 = vcvt.f32.s32 %v834_v29  ;;  %vm972_vm14 = vcmp.eq.s32.totalorder %v3236_v42, %v852_v19  ;;  %v963_v19 = vshll.u32 %v962_v43, 16 }
 0x3ac   : > { %v3499_v3 = vsel %vm972_vm14, inf, %v3205_v31 }
 0x3ad   : > { %v838_v30 = vadd.s32 %v837_v7, %v835_v8  ;;  %1083 = vmin.xlane.f32.xlu0 %v3499_v3 }
 0x3ae   : > { %v876_v48 = vpop.xlane.xlu0 %875 }
 0x3af   : > { %v877_v44 = vcvt.f32.s32 %v876_v48  ;;  %vm971_vm15 = vcmp.eq.s32.totalorder %v3236_v42, %v838_v30 }
 0x3b0   : > { %v3505_v11 = vsel %vm971_vm15, inf, %v3208_v32  ;;  %vm2399_vm0 = vmpackc.low %vm972_vm14, %vm971_vm15 }
 0x3b1   : > { %v880_v47 = vadd.s32 %v879_v57, %v877_v44  ;;  %1081 = vmin.xlane.f32.xlu1 %v3505_v11  ;;  %2560 = vmatpush3.bf16.xpose.msk.msra.mxu1 %vm2399_vm0, %v2912_v17 }
 0x3b2   : > { %v862_v31 = vpop.xlane.xlu1 %861  ;;  %2561 = vmatprep.subr.bf16.mxu1 %v2910_v1 }
 0x3b3   : > { %v863_v13 = vcvt.f32.s32 %v862_v31  ;;  %vm974_vm1 = vcmp.eq.s32.totalorder %v3236_v42, %v880_v47 }
 0x3b4   : > { %v3513_v49 = vsel %vm974_vm1, inf, %v3211_v33  ;;  %v934_v33 = vcvt.f32.s32 %v3428_v10 }
 0x3b5   : > { %v866_v32 = vadd.s32 %v865_v12, %v863_v13  ;;  %1087 = vmin.xlane.f32.xlu0 %v3513_v49 }
 0x3b6   : > { %v890_v52 = vpop.xlane.xlu1 %889  ;;  %v935_v41 = vshll.u32 %v934_v33, 16 }
 0x3b7   : > { %v891_v25 = vcvt.f32.s32 %v890_v52  ;;  %vm973_vm2 = vcmp.eq.s32.totalorder %v3236_v42, %v866_v32 }
 0x3b8   : > { %v3519_v20 = vsel %vm973_vm2, inf, %v3214_v34  ;;  %vm2401_vm3 = vmpackc.low %vm974_vm1, %vm973_vm2 }
 0x3b9   : > { %v894_v51 = vadd.s32 %v893_v24, %v891_v25  ;;  %1085 = vmin.xlane.f32.xlu1 %v3519_v20  ;;  %2562 = vmatpush3.bf16.xpose.msk.msra.mxu1 %vm2401_vm3, %v2912_v17 }
 0x3ba   : > { %v904_v56 = vpop.xlane.xlu0 %903  ;;  %2563 = vmatprep.subr.bf16.mxu1 %v2910_v1 }
 0x3bb   : > { %v905_v26 = vcvt.f32.s32 %v904_v56  ;;  %vm975_vm4 = vcmp.eq.s32.totalorder %v3236_v42, %v894_v51 }
 0x3bc   : > { %v3528_v34 = vsel %vm975_vm4, inf, %v3220_v36 }
 0x3bd   : > { %v908_v18 = vadd.s32 %v907_v59, %v905_v26  ;;  %1089 = vmin.xlane.f32.xlu1 %v3528_v34 }
 0x3be   : > { %v918_v60 = vpop.xlane.xlu1 %917  ;;  %v932_v10 = vpop.xlane.xlu0 %931 }
 0x3bf   : > { %v919_v27 = vcvt.f32.s32 %v918_v60  ;;  %v933_v23 = vcvt.f32.s32 %v932_v10  ;;  %vm976_vm5 = vcmp.eq.s32.totalorder %v3236_v42, %v908_v18 }
 0x3c0   : > { %v3534_v22 = vsel %vm976_vm5, inf, %v3217_v35  ;;  %vm2403_vm6 = vmpackc.low %vm976_vm5, %vm975_vm4 }
 0x3c1   : > { %v922_v55 = vadd.s32 %v921_v4, %v919_v27  ;;  %v936_v36 = vadd.s32 %v935_v41, %v933_v23  ;;  %1091 = vmin.xlane.f32.xlu0 %v3534_v22  ;;  %2564 = vmatpush3.bf16.xpose.msk.msra.mxu1 %vm2403_vm6, %v2912_v17 }
 0x3c2   : > { %v946_v28 = vpop.xlane.xlu1 %945  ;;  %2565 = vmatprep.subr.bf16.mxu1 %v2910_v1 }
 0x3c3   : > { %v947_v50 = vcvt.f32.s32 %v946_v28  ;;  %vm977_vm7 = vcmp.eq.s32.totalorder %v3236_v42, %v922_v55  ;;  %vm978_vm8 = vcmp.eq.s32.totalorder %v3236_v42, %v936_v36 }
 0x3c4   : > { %v3543_v35 = vsel %vm977_vm7, inf, %v3226_v38  ;;  %v3546_v63 = vsel %vm978_vm8, inf, %v3223_v37  ;;  %vm2405_vm11 = vmpackc.low %vm978_vm8, %vm977_vm7 }
 0x3c5   : > { %v950_v61 = vadd.s32 %v949_v62, %v947_v50  ;;  %1093 = vmin.xlane.f32.xlu1 %v3543_v35  ;;  %1095 = vmin.xlane.f32.xlu0 %v3546_v63 }
 0x3c6   : > { %v960_v46 = vpop.xlane.xlu0 %959 }
 0x3c7   : > { %v961_v29 = vcvt.f32.s32 %v960_v46  ;;  %vm979_vm10 = vcmp.eq.s32.totalorder %v3236_v42, %v950_v61 }
 0x3c8   : > { %v3552_v0 = vsel %vm979_vm10, inf, %v3231_v40 }
 0x3c9   : > { %v964_v7 = vadd.s32 %v963_v19, %v961_v29  ;;  %1097 = vmin.xlane.f32.xlu1 %v3552_v0  ;;  %2566 = vmatpush3.bf16.xpose.msk.msra.mxu1 %vm2405_vm11, %v2912_v17 }
 0x3ca   : > { %2567 = vmatprep.subr.bf16.mxu1 %v2910_v1 }
 0x3cb   : > { %vm980_vm12 = vcmp.eq.s32.totalorder %v3236_v42, %v964_v7 }
 0x3cc   : > { %v3559_v37 = vsel %vm980_vm12, inf, %v3229_v39  ;;  %vm2407_vm13 = vmpackc.low %vm980_vm12, %vm979_vm10 }
 0x3cd   : > { %1099 = vmin.xlane.f32.xlu0 %v3559_v37 }
 0x3d1   : > { %2568 = vmatpush3.bf16.xpose.msk.msra.mxu1 %vm2407_vm13, %v2912_v17 }
 0x3d2   : > { %2593 = vmatprep.subr.bf16.mxu1 %v2910_v1 }
 0x422   : > { %v1072_v38 = vpop.xlane.xlu0 %1071 }
 0x423   : > { %vm1102_vm14 = vcmp.le.f32.partialorder %v3457_v2, %v1072_v38 }
 0x424   : > { %v3566_v40 = vsel %vm1102_vm14, %v3236_v42, 128 }
 0x425   : > { %v1148_v9 = vshra.s32 %v3566_v40, 16 }
 0x426   : > { %v1070_v8 = vpop.xlane.xlu1 %1069 }
 0x427   : > { %vm1101_vm15 = vcmp.le.f32.partialorder %v3463_v15, %v1070_v8  ;;  %v3570_v39 = vcvt.s32.f32 %v1148_v9 }
 0x428   : > { %v3573_v30 = vsel %vm1101_vm15, %v3236_v42, 128 }
 0x429   : > { %1151 = vmin.xlane.f32.xlu0 %v3570_v39  ;;  %v1134_v48 = vshra.s32 %v3573_v30, 16 }
 0x42a   : > { %v1076_v57 = vpop.xlane.xlu0 %1075 }
 0x42b   : > { %vm1104_vm0 = vcmp.le.f32.partialorder %v3471_v21, %v1076_v57  ;;  %v3578_v6 = vcvt.s32.f32 %v1134_v48 }
 0x42c   : > { %v3581_v44 = vsel %vm1104_vm0, %v3236_v42, 128 }
 0x42d   : > { %1137 = vmin.xlane.f32.xlu1 %v3578_v6  ;;  %v1176_v47 = vshra.s32 %v3581_v44, 16 }
 0x42e   : > { %v1074_v31 = vpop.xlane.xlu1 %1073 }
 0x42f   : > { %vm1103_vm1 = vcmp.le.f32.partialorder %v3477_v53, %v1074_v31  ;;  %v3586_v12 = vcvt.s32.f32 %v1176_v47 }
 0x430   : > { %v3589_v16 = vsel %vm1103_vm1, %v3236_v42, 128 }
 0x431   : > { %1179 = vmin.xlane.f32.xlu0 %v3586_v12  ;;  %v1162_v13 = vshra.s32 %v3589_v16, 16 }
 0x432   : > { %v1080_v32 = vpop.xlane.xlu0 %1079 }
 0x433   : > { %vm1106_vm2 = vcmp.le.f32.partialorder %v3485_v14, %v1080_v32  ;;  %v3594_v52 = vcvt.s32.f32 %v1162_v13 }
 0x434   : > { %v3597_v24 = vsel %vm1106_vm2, %v3236_v42, 128 }
 0x435   : > { %1165 = vmin.xlane.f32.xlu1 %v3594_v52  ;;  %v1204_v45 = vshra.s32 %v3597_v24, 16 }
 0x436   : > { %v1078_v25 = vpop.xlane.xlu1 %1077 }
 0x437   : > { %vm1105_vm3 = vcmp.le.f32.partialorder %v3491_v5, %v1078_v25  ;;  %v3602_v51 = vcvt.s32.f32 %v1204_v45 }
 0x438   : > { %v3605_v33 = vsel %vm1105_vm3, %v3236_v42, 128 }
 0x439   : > { %1207 = vmin.xlane.f32.xlu0 %v3602_v51  ;;  %v1190_v56 = vshra.s32 %v3605_v33, 16 }
 0x43a   : > { %v1084_v59 = vpop.xlane.xlu0 %1083 }
 0x43b   : > { %vm1108_vm4 = vcmp.le.f32.partialorder %v3499_v3, %v1084_v59  ;;  %v3610_v54 = vcvt.s32.f32 %v1190_v56 }
 0x43c   : > { %v3613_v26 = vsel %vm1108_vm4, %v3236_v42, 128 }
 0x43d   : > { %1193 = vmin.xlane.f32.xlu1 %v3610_v54  ;;  %v1232_v18 = vshra.s32 %v3613_v26, 16 }
 0x43e   : > { %v1082_v41 = vpop.xlane.xlu1 %1081 }
 0x43f   : > { %vm1107_vm5 = vcmp.le.f32.partialorder %v3505_v11, %v1082_v41  ;;  %v3618_v58 = vcvt.s32.f32 %v1232_v18 }
 0x440   : > { %v3621_v60 = vsel %vm1107_vm5, %v3236_v42, 128 }
 0x441   : > { %1235 = vmin.xlane.f32.xlu0 %v3618_v58  ;;  %v1218_v10 = vshra.s32 %v3621_v60, 16 }
 0x442   : > { %v1088_v4 = vpop.xlane.xlu0 %1087 }
 0x443   : > { %vm1110_vm6 = vcmp.le.f32.partialorder %v3513_v49, %v1088_v4  ;;  %v3626_v27 = vcvt.s32.f32 %v1218_v10 }
 0x444   : > { %v3629_v23 = vsel %vm1110_vm6, %v3236_v42, 128 }
 0x445   : > { %1221 = vmin.xlane.f32.xlu1 %v3626_v27  ;;  %v1260_v55 = vshra.s32 %v3629_v23, 16 }
 0x446   : > { %v1086_v36 = vpop.xlane.xlu1 %1085 }
 0x447   : > { %vm1109_vm7 = vcmp.le.f32.partialorder %v3519_v20, %v1086_v36  ;;  %v3634_v62 = vcvt.s32.f32 %v1260_v55 }
 0x448   : > { %v3637_v28 = vsel %vm1109_vm7, %v3236_v42, 128 }
 0x449   : > { %v1246_v43 = vshra.s32 %v3637_v28, 16  ;;  %1263 = vmin.xlane.f32.xlu0 %v3634_v62 }
 0x44a   : > { %v1090_v50 = vpop.xlane.xlu1 %1089 }
 0x44b   : > { %vm1111_vm8 = vcmp.le.f32.partialorder %v3528_v34, %v1090_v50  ;;  %v3642_v61 = vcvt.s32.f32 %v1246_v43  ;;  %v1147_v43 = vand.u32 65535, %v3566_v40  ;;  %v1133_v50 = vand.u32 65535, %v3573_v30 }
 0x44c   : > { %v3645_v46 = vsel %vm1111_vm8, %v3236_v42, 128  ;;  %v1161_v40 = vand.u32 65535, %v3589_v16  ;;  %v1189_v16 = vand.u32 65535, %v3605_v33  ;;  %v1217_v33 = vand.u32 65535, %v3621_v60 }
 0x44d   : > { %v1274_v19 = vshra.s32 %v3645_v46, 16  ;;  %1249 = vmin.xlane.f32.xlu1 %v3642_v61  ;;  %v1245_v60 = vand.u32 65535, %v3637_v28 }
 0x44e   : > { %v1092_v29 = vpop.xlane.xlu0 %1091 }
 0x44f   : > { %vm1112_vm10 = vcmp.le.f32.partialorder %v3534_v22, %v1092_v29  ;;  %v3650_v7 = vcvt.s32.f32 %v1274_v19  ;;  %v1149_v29 = vcvt.s32.f32 %v1147_v43 }
 0x450   : > { %v3653_v38 = vsel %vm1112_vm10, %v3236_v42, 128 }
 0x451   : > { %1277 = vmin.xlane.f32.xlu1 %v3650_v7  ;;  %v1288_v9 = vshra.s32 %v3653_v38, 16 }
 0x452   : > { %v1094_v8 = vpop.xlane.xlu1 %1093  ;;  %v1096_v48 = vpop.xlane.xlu0 %1095 }
 0x453   : > { %vm1113_vm11 = vcmp.le.f32.partialorder %v3543_v35, %v1094_v8  ;;  %vm1114_vm12 = vcmp.le.f32.partialorder %v3546_v63, %v1096_v48  ;;  %v3659_v57 = vcvt.s32.f32 %v1288_v9  ;;  %v1135_v48 = vcvt.s32.f32 %v1133_v50 }
 0x454   : > { %v3662_v47 = vsel %vm1113_vm11, %v3236_v42, 128  ;;  %v3665_v31 = vsel %vm1114_vm12, %v3236_v42, 128 }
 0x455   : > { %v1302_v13 = vshra.s32 %v3662_v47, 16  ;;  %1291 = vmin.xlane.f32.xlu0 %v3659_v57  ;;  %v1316_v32 = vshra.s32 %v3665_v31, 16 }
 0x456   : > { %v1098_v45 = vpop.xlane.xlu1 %1097 }
 0x457   : > { %vm1115_vm13 = vcmp.le.f32.partialorder %v3552_v0, %v1098_v45  ;;  %v3671_v25 = vcvt.s32.f32 %v1302_v13  ;;  %v3673_v56 = vcvt.s32.f32 %v1316_v32  ;;  %v1175_v13 = vand.u32 65535, %v3581_v44 }
 0x458   : > { %v3676_v59 = vsel %vm1115_vm13, %v3236_v42, 128  ;;  %v1203_v44 = vand.u32 65535, %v3597_v24  ;;  %v1231_v24 = vand.u32 65535, %v3613_v26  ;;  %v1259_v26 = vand.u32 65535, %v3629_v23 }
 0x459   : > { %v1330_v18 = vshra.s32 %v3676_v59, 16  ;;  %1305 = vmin.xlane.f32.xlu1 %v3671_v25  ;;  %1319 = vmin.xlane.f32.xlu0 %v3673_v56  ;;  %v1177_v45 = vcvt.s32.f32 %v1175_v13  ;;  %v1247_v23 = vcvt.s32.f32 %v1245_v60 }
 0x45a   : > { %v1100_v41 = vpop.xlane.xlu0 %1099  ;;  %v1205_v43 = vcvt.s32.f32 %v1203_v44 }
 0x45b   : > { %vm1116_vm14 = vcmp.le.f32.partialorder %v3559_v37, %v1100_v41  ;;  %v3682_v10 = vcvt.s32.f32 %v1330_v18  ;;  %v1163_v41 = vcvt.s32.f32 %v1161_v40 }
 0x45c   : > { %v3685_v4 = vsel %vm1116_vm14, %v3236_v42, 128 }
 0x45d   : > { %1333 = vmin.xlane.f32.xlu1 %v3682_v10  ;;  %v1344_v55 = vshra.s32 %v3685_v4, 16 }
 0x45f   : > { %v3689_v36 = vcvt.s32.f32 %v1344_v55 }
 0x461   : > { %1347 = vmin.xlane.f32.xlu0 %v3689_v36 }
 0x4b6   : > { %v3694_v19 = vpop.xlane.xlu0 %1151 }
 0x4b7   : > { %vm1153_vm15 = vcmp.eq.f32.partialorder %v3570_v39, %v3694_v19 }
 0x4b8   : > { %v1154_v9 = vsel %vm1153_vm15, %v1149_v29, inf  ;;  %v1191_v29 = vcvt.s32.f32 %v1189_v16  ;;  %v1315_v16 = vand.u32 65535, %v3665_v31 }
 0x4b9   : > { %1155 = vmin.xlane.f32.xlu0 %v1154_v9 }
 0x4ba   : > { %v3698_v8 = vpop.xlane.xlu1 %1137 }
 0x4bb   : > { %vm1139_vm0 = vcmp.eq.f32.partialorder %v3578_v6, %v3698_v8 }
 0x4bc   : > { %v1140_v32 = vsel %vm1139_vm0, %v1135_v48, inf  ;;  %v1233_v48 = vcvt.s32.f32 %v1231_v24 }
 0x4bd   : > { %1141 = vmin.xlane.f32.xlu1 %v1140_v32  ;;  %v1219_v32 = vcvt.s32.f32 %v1217_v33 }
 0x4be   : > { %v3704_v30 = vpop.xlane.xlu0 %1179 }
 0x4bf   : > { %vm1181_vm1 = vcmp.eq.f32.partialorder %v3586_v12, %v3704_v30 }
 0x4c0   : > { %v1182_v39 = vsel %vm1181_vm1, %v1177_v45, inf  ;;  %v1261_v45 = vcvt.s32.f32 %v1259_v26 }
 0x4c1   : > { %1183 = vmin.xlane.f32.xlu0 %v1182_v39  ;;  %v1273_v39 = vand.u32 65535, %v3645_v46  ;;  %v1301_v46 = vand.u32 65535, %v3662_v47 }
 0x4c2   : > { %v3708_v18 = vpop.xlane.xlu1 %1165 }
 0x4c3   : > { %vm1167_vm2 = vcmp.eq.f32.partialorder %v3594_v52, %v3708_v18  ;;  %v1275_v28 = vcvt.s32.f32 %v1273_v39  ;;  %v1186_v39 = vcvt.f32.s32 %v3704_v30 }
 0x4c4   : > { %v1168_v6 = vsel %vm1167_vm2, %v1163_v41, inf }
 0x4c5   : > { %1169 = vmin.xlane.f32.xlu1 %v1168_v6  ;;  %v1287_v6 = vand.u32 65535, %v3653_v38 }
 0x4c6   : > { %v3714_v55 = vpop.xlane.xlu0 %1207 }
 0x4c7   : > { %vm1209_vm3 = vcmp.eq.f32.partialorder %v3602_v51, %v3714_v55 }
 0x4c8   : > { %v1210_v12 = vsel %vm1209_vm3, %v1205_v43, inf }
 0x4c9   : > { %1211 = vmin.xlane.f32.xlu0 %v1210_v12  ;;  %v1289_v12 = vcvt.s32.f32 %v1287_v6  ;;  %v1172_v6 = vcvt.f32.s32 %v3708_v18 }
 0x4ca   : > { %v3718_v50 = vpop.xlane.xlu1 %1193 }
 0x4cb   : > { %vm1195_vm4 = vcmp.eq.f32.partialorder %v3610_v54, %v3718_v50 }
 0x4cc   : > { %v1196_v52 = vsel %vm1195_vm4, %v1191_v29, inf  ;;  %v1329_v29 = vand.u32 65535, %v3676_v59 }
 0x4cd   : > { %1197 = vmin.xlane.f32.xlu1 %v1196_v52  ;;  %v1317_v52 = vcvt.s32.f32 %v1315_v16  ;;  %v1214_v16 = vcvt.f32.s32 %v3714_v55 }
 0x4ce   : > { %v3724_v9 = vpop.xlane.xlu0 %1235  ;;  %v1331_v59 = vcvt.s32.f32 %v1329_v29 }
 0x4cf   : > { %vm1237_vm5 = vcmp.eq.f32.partialorder %v3618_v58, %v3724_v9  ;;  %v1215_v29 = vshll.u32 %v1214_v16, 16 }
 0x4d0   : > { %v1238_v51 = vsel %vm1237_vm5, %v1233_v48, inf }
 0x4d1   : > { %1239 = vmin.xlane.f32.xlu0 %v1238_v51 }
 0x4d2   : > { %v3728_v13 = vpop.xlane.xlu1 %1221 }
 0x4d3   : > { %vm1223_vm6 = vcmp.eq.f32.partialorder %v3626_v27, %v3728_v13 }
 0x4d4   : > { %v1224_v54 = vsel %vm1223_vm6, %v1219_v32, inf  ;;  %v1158_v32 = vcvt.f32.s32 %v3694_v19 }
 0x4d5   : > { %1225 = vmin.xlane.f32.xlu1 %v1224_v54  ;;  %v1144_v54 = vcvt.f32.s32 %v3698_v8 }
 0x4d6   : > { %v3734_v40 = vpop.xlane.xlu0 %1263 }
 0x4d7   : > { %vm1265_vm7 = vcmp.eq.f32.partialorder %v3634_v62, %v3734_v40 }
 0x4d8   : > { %v1266_v58 = vsel %vm1265_vm7, %v1261_v45, inf }
 0x4d9   : > { %1267 = vmin.xlane.f32.xlu0 %v1266_v58 }
 0x4da   : > { %v3739_v41 = vpop.xlane.xlu1 %1249 }
 0x4db   : > { %vm1251_vm8 = vcmp.eq.f32.partialorder %v3642_v61, %v3739_v41 }
 0x4dc   : > { %v1252_v27 = vsel %vm1251_vm8, %v1247_v23, inf }
 0x4dd   : > { %1253 = vmin.xlane.f32.xlu1 %v1252_v27 }
 0x4de   : > { %v3743_v44 = vpop.xlane.xlu1 %1277 }
 0x4df   : > { %vm1279_vm10 = vcmp.eq.f32.partialorder %v3650_v7, %v3743_v44  ;;  %v1303_v7 = vcvt.s32.f32 %v1301_v46  ;;  %v1173_v46 = vshll.u32 %v1172_v6, 16 }
 0x4e0   : > { %v1280_v62 = vsel %vm1279_vm10, %v1275_v28, inf  ;;  %v1187_v28 = vshll.u32 %v1186_v39, 16 }
 0x4e1   : > { %1281 = vmin.xlane.f32.xlu1 %v1280_v62 }
 0x4e2   : > { %v3750_v43 = vpop.xlane.xlu0 %1291 }
 0x4e3   : > { %vm1293_vm11 = vcmp.eq.f32.partialorder %v3659_v57, %v3750_v43  ;;  %v1343_v57 = vand.u32 65535, %v3685_v4  ;;  %v1159_v4 = vshll.u32 %v1158_v32, 16 }
 0x4e4   : > { %v1294_v61 = vsel %vm1293_vm11, %v1289_v12, inf }
 0x4e5   : > { %1295 = vmin.xlane.f32.xlu0 %v1294_v61 }
 0x4e6   : > { %v3755_v38 = vpop.xlane.xlu1 %1305  ;;  %v3757_v24 = vpop.xlane.xlu0 %1319 }
 0x4e7   : > { %vm1307_vm12 = vcmp.eq.f32.partialorder %v3671_v25, %v3755_v38  ;;  %vm1321_vm13 = vcmp.eq.f32.partialorder %v3673_v56, %v3757_v24  ;;  %v1345_v25 = vcvt.s32.f32 %v1343_v57  ;;  %v1242_v57 = vcvt.f32.s32 %v3724_v9 }
 0x4e8   : > { %v1308_v47 = vsel %vm1307_vm12, %v1303_v7, inf  ;;  %v1322_v31 = vsel %vm1321_vm13, %v1317_v52, inf  ;;  %v1200_v7 = vcvt.f32.s32 %v3718_v50 }
 0x4e9   : > { %1309 = vmin.xlane.f32.xlu1 %v1308_v47  ;;  %1323 = vmin.xlane.f32.xlu0 %v1322_v31 }
 0x4ea   : > { %v3764_v33 = vpop.xlane.xlu1 %1333  ;;  %v1201_v31 = vshll.u32 %v1200_v7, 16 }
 0x4eb   : > { %vm1335_vm14 = vcmp.eq.f32.partialorder %v3682_v10, %v3764_v33  ;;  %v1145_v10 = vshll.u32 %v1144_v54, 16  ;;  %v1270_v54 = vcvt.f32.s32 %v3734_v40  ;;  %v1340_v7 = vcvt.f32.s32 %v3764_v33 }
 0x4ec   : > { %v1336_v48 = vsel %vm1335_vm14, %v1331_v59, inf }
 0x4ed   : > { %1337 = vmin.xlane.f32.xlu1 %v1336_v48 }
 0x4ee   : > { %v3768_v51 = vpop.xlane.xlu0 %1347 }
 0x4ef   : > { %vm1349_vm15 = vcmp.eq.f32.partialorder %v3689_v36, %v3768_v51  ;;  %v1354_v33 = vcvt.f32.s32 %v3768_v51 }
 0x4f0   : > { %v1350_v56 = vsel %vm1349_vm15, %v1345_v25, inf  ;;  %v1243_v25 = vshll.u32 %v1242_v57, 16 }
 0x4f1   : > { %1351 = vmin.xlane.f32.xlu0 %v1350_v56  ;;  %v1228_v56 = vcvt.f32.s32 %v3728_v13 }
 0x546   : > { %v1156_v26 = vpop.xlane.xlu0 %1155 }
 0x547   : > { %v1157_v60 = vcvt.f32.s32 %v1156_v26 }
 0x549   : > { %v1160_v45 = vadd.s32 %v1159_v4, %v1157_v60  ;;  %v1229_v4 = vshll.u32 %v1228_v56, 16 }
 0x54a   : > { %v1142_v58 = vpop.xlane.xlu1 %1141 }
 0x54b   : > { %v1143_v23 = vcvt.f32.s32 %v1142_v58  ;;  %vm1358_vm0 = vcmp.eq.s32.totalorder %v3236_v42, %v1160_v45  ;;  %v1271_v58 = vshll.u32 %v1270_v54, 16 }
 0x54c   : > { %v3777_v27 = vsel %vm1358_vm0, inf, %v3457_v2 }
 0x54d   : > { %v1146_v36 = vadd.s32 %v1145_v10, %v1143_v23  ;;  %1458 = vmin.xlane.f32.xlu0 %v3777_v27  ;;  %v1256_v10 = vcvt.f32.s32 %v3739_v41 }
 0x54e   : > { %v1184_v19 = vpop.xlane.xlu0 %1183 }
 0x54f   : > { %v1185_v8 = vcvt.f32.s32 %v1184_v19  ;;  %vm1357_vm1 = vcmp.eq.s32.totalorder %v3236_v42, %v1146_v36  ;;  %v1257_v36 = vshll.u32 %v1256_v10, 16  ;;  %v1284_v19 = vcvt.f32.s32 %v3743_v44 }
 0x550   : > { %v3783_v62 = vsel %vm1357_vm1, inf, %v3463_v15  ;;  %vm2409_vm2 = vmpackc.low %vm1358_vm0, %vm1357_vm1 }
 0x551   : > { %v1188_v30 = vadd.s32 %v1187_v28, %v1185_v8  ;;  %1456 = vmin.xlane.f32.xlu1 %v3783_v62  ;;  %2574 = vmatpush3.bf16.xpose.msk.msra.mxu0 %vm2409_vm2, %v2912_v17  ;;  %v1285_v8 = vshll.u32 %v1284_v19, 16 }
 0x552   : > { %v1170_v2 = vpop.xlane.xlu1 %1169  ;;  %2575 = vmatprep.subr.bf16.mxu0 %v2910_v1 }
 0x553   : > { %v1171_v12 = vcvt.f32.s32 %v1170_v2  ;;  %vm1360_vm3 = vcmp.eq.s32.totalorder %v3236_v42, %v1188_v30  ;;  %v1298_v30 = vcvt.f32.s32 %v3750_v43  ;;  %v1326_v43 = vcvt.f32.s32 %v3757_v24 }
 0x554   : > { %v3791_v18 = vsel %vm1360_vm3, inf, %v3471_v21 }
 0x555   : > { %v1174_v15 = vadd.s32 %v1173_v46, %v1171_v12  ;;  %1462 = vmin.xlane.f32.xlu0 %v3791_v18  ;;  %v1299_v12 = vshll.u32 %v1298_v30, 16 }
 0x556   : > { %v1212_v61 = vpop.xlane.xlu0 %1211 }
 0x557   : > { %v1213_v52 = vcvt.f32.s32 %v1212_v61  ;;  %vm1359_vm4 = vcmp.eq.s32.totalorder %v3236_v42, %v1174_v15 }
 0x558   : > { %v3797_v47 = vsel %vm1359_vm4, inf, %v3477_v53  ;;  %vm2411_vm5 = vmpackc.low %vm1360_vm3, %vm1359_vm4 }
 0x559   : > { %v1216_v55 = vadd.s32 %v1215_v29, %v1213_v52  ;;  %1460 = vmin.xlane.f32.xlu1 %v3797_v47  ;;  %2576 = vmatpush3.bf16.xpose.msk.msra.mxu0 %vm2411_vm5, %v2912_v17 }
 0x55a   : > { %v1198_v21 = vpop.xlane.xlu1 %1197  ;;  %2577 = vmatprep.subr.bf16.mxu0 %v2910_v1 }
 0x55b   : > { %v1199_v59 = vcvt.f32.s32 %v1198_v21  ;;  %vm1362_vm6 = vcmp.eq.s32.totalorder %v3236_v42, %v1216_v55  ;;  %v1327_v55 = vshll.u32 %v1326_v43, 16 }
 0x55c   : > { %v3805_v50 = vsel %vm1362_vm6, inf, %v3485_v14 }
 0x55d   : > { %v1202_v53 = vadd.s32 %v1201_v31, %v1199_v59  ;;  %1466 = vmin.xlane.f32.xlu0 %v3805_v50  ;;  %v1341_v59 = vshll.u32 %v1340_v7, 16 }
 0x55e   : > { %v1240_v48 = vpop.xlane.xlu0 %1239 }
 0x55f   : > { %v1241_v32 = vcvt.f32.s32 %v1240_v48  ;;  %vm1361_vm7 = vcmp.eq.s32.totalorder %v3236_v42, %v1202_v53 }
 0x560   : > { %v3811_v26 = vsel %vm1361_vm7, inf, %v3491_v5  ;;  %vm2413_vm8 = vmpackc.low %vm1362_vm6, %vm1361_vm7 }
 0x561   : > { %v1244_v9 = vadd.s32 %v1243_v25, %v1241_v32  ;;  %1464 = vmin.xlane.f32.xlu1 %v3811_v26  ;;  %2578 = vmatpush3.bf16.xpose.msk.msra.mxu0 %vm2413_vm8, %v2912_v17 }
 0x562   : > { %v1226_v14 = vpop.xlane.xlu1 %1225  ;;  %2579 = vmatprep.subr.bf16.mxu0 %v2910_v1 }
 0x563   : > { %v1227_v60 = vcvt.f32.s32 %v1226_v14  ;;  %vm1364_vm10 = vcmp.eq.s32.totalorder %v3236_v42, %v1244_v9  ;;  %v1355_v9 = vshll.u32 %v1354_v33, 16 }
 0x564   : > { %v3819_v13 = vsel %vm1364_vm10, inf, %v3499_v3 }
 0x565   : > { %v1230_v5 = vadd.s32 %v1229_v4, %v1227_v60  ;;  %1470 = vmin.xlane.f32.xlu0 %v3819_v13 }
 0x566   : > { %v1268_v45 = vpop.xlane.xlu0 %1267 }
 0x567   : > { %v1269_v39 = vcvt.f32.s32 %v1268_v45  ;;  %vm1363_vm11 = vcmp.eq.s32.totalorder %v3236_v42, %v1230_v5 }
 0x568   : > { %v3825_v23 = vsel %vm1363_vm11, inf, %v3505_v11  ;;  %vm2415_vm12 = vmpackc.low %vm1364_vm10, %vm1363_vm11 }
 0x569   : > { %v1272_v40 = vadd.s32 %v1271_v58, %v1269_v39  ;;  %1468 = vmin.xlane.f32.xlu1 %v3825_v23  ;;  %2580 = vmatpush3.bf16.xpose.msk.msra.mxu0 %vm2415_vm12, %v2912_v17 }
 0x56a   : > { %v1254_v3 = vpop.xlane.xlu1 %1253  ;;  %2581 = vmatprep.subr.bf16.mxu0 %v2910_v1 }
 0x56b   : > { %v1255_v28 = vcvt.f32.s32 %v1254_v3  ;;  %vm1366_vm13 = vcmp.eq.s32.totalorder %v3236_v42, %v1272_v40 }
 0x56c   : > { %v3833_v41 = vsel %vm1366_vm13, inf, %v3513_v49  ;;  %v1312_v49 = vcvt.f32.s32 %v3755_v38 }
 0x56d   : > { %v1258_v11 = vadd.s32 %v1257_v36, %v1255_v28  ;;  %1474 = vmin.xlane.f32.xlu0 %v3833_v41 }
 0x56e   : > { %v1282_v6 = vpop.xlane.xlu1 %1281  ;;  %v1313_v29 = vshll.u32 %v1312_v49, 16 }
 0x56f   : > { %v1283_v2 = vcvt.f32.s32 %v1282_v6  ;;  %vm1365_vm14 = vcmp.eq.s32.totalorder %v3236_v42, %v1258_v11 }
 0x570   : > { %v3839_v46 = vsel %vm1365_vm14, inf, %v3519_v20  ;;  %vm2417_vm15 = vmpackc.low %vm1366_vm13, %vm1365_vm14 }
 0x571   : > { %v1286_v44 = vadd.s32 %v1285_v8, %v1283_v2  ;;  %1472 = vmin.xlane.f32.xlu1 %v3839_v46  ;;  %2582 = vmatpush3.bf16.xpose.msk.msra.mxu0 %vm2417_vm15, %v2912_v17 }
 0x572   : > { %v1296_v16 = vpop.xlane.xlu0 %1295  ;;  %2583 = vmatprep.subr.bf16.mxu0 %v2910_v1 }
 0x573   : > { %v1297_v15 = vcvt.f32.s32 %v1296_v16  ;;  %vm1367_vm0 = vcmp.eq.s32.totalorder %v3236_v42, %v1286_v44 }
 0x574   : > { %v3848_v20 = vsel %vm1367_vm0, inf, %v3528_v34 }
 0x575   : > { %v1300_v61 = vadd.s32 %v1299_v12, %v1297_v15  ;;  %1476 = vmin.xlane.f32.xlu1 %v3848_v20 }
 0x576   : > { %v1310_v52 = vpop.xlane.xlu1 %1309  ;;  %v1324_v38 = vpop.xlane.xlu0 %1323 }
 0x577   : > { %v1311_v21 = vcvt.f32.s32 %v1310_v52  ;;  %v1325_v31 = vcvt.f32.s32 %v1324_v38  ;;  %vm1368_vm1 = vcmp.eq.s32.totalorder %v3236_v42, %v1300_v61 }
 0x578   : > { %v3854_v24 = vsel %vm1368_vm1, inf, %v3534_v22  ;;  %vm2419_vm2 = vmpackc.low %vm1368_vm1, %vm1367_vm0 }
 0x579   : > { %v1314_v57 = vadd.s32 %v1313_v29, %v1311_v21  ;;  %v1328_v34 = vadd.s32 %v1327_v55, %v1325_v31  ;;  %1478 = vmin.xlane.f32.xlu0 %v3854_v24  ;;  %2584 = vmatpush3.bf16.xpose.msk.msra.mxu0 %vm2419_vm2, %v2912_v17 }
 0x57a   : > { %v1338_v53 = vpop.xlane.xlu1 %1337  ;;  %2585 = vmatprep.subr.bf16.mxu0 %v2910_v1 }
 0x57b   : > { %v1339_v48 = vcvt.f32.s32 %v1338_v53  ;;  %vm1369_vm3 = vcmp.eq.s32.totalorder %v3236_v42, %v1314_v57  ;;  %vm1370_vm4 = vcmp.eq.s32.totalorder %v3236_v42, %v1328_v34 }
 0x57c   : > { %v3863_v22 = vsel %vm1369_vm3, inf, %v3543_v35  ;;  %v3866_v25 = vsel %vm1370_vm4, inf, %v3546_v63  ;;  %vm2421_vm6 = vmpackc.low %vm1370_vm4, %vm1369_vm3 }
 0x57d   : > { %v1342_v56 = vadd.s32 %v1341_v59, %v1339_v48  ;;  %1480 = vmin.xlane.f32.xlu1 %v3863_v22  ;;  %1482 = vmin.xlane.f32.xlu0 %v3866_v25 }
 0x57e   : > { %v1352_v32 = vpop.xlane.xlu0 %1351 }
 0x57f   : > { %v1353_v14 = vcvt.f32.s32 %v1352_v32  ;;  %vm1371_vm5 = vcmp.eq.s32.totalorder %v3236_v42, %v1342_v56 }
 0x580   : > { %v3872_v51 = vsel %vm1371_vm5, inf, %v3552_v0 }
 0x581   : > { %v1356_v4 = vadd.s32 %v1355_v9, %v1353_v14  ;;  %1484 = vmin.xlane.f32.xlu1 %v3872_v51  ;;  %2586 = vmatpush3.bf16.xpose.msk.msra.mxu0 %vm2421_vm6, %v2912_v17 }
 0x582   : > { %2587 = vmatprep.subr.bf16.mxu0 %v2910_v1 }
 0x583   : > { %vm1372_vm7 = vcmp.eq.s32.totalorder %v3236_v42, %v1356_v4 }
 0x584   : > { %v3879_v35 = vsel %vm1372_vm7, inf, %v3559_v37  ;;  %vm2423_vm8 = vmpackc.low %vm1372_vm7, %vm1371_vm5 }
 0x585   : > { %1486 = vmin.xlane.f32.xlu0 %v3879_v35 }
 0x589   : > { %2588 = vmatpush3.bf16.xpose.msk.msra.mxu0 %vm2423_vm8, %v2912_v17 }
 0x58a   : > { %2613 = vmatprep.subr.bf16.mxu0 %v2910_v1 }
 0x5da   : > { %v1459_v63 = vpop.xlane.xlu0 %1458 }
 0x5db   : > { %vm1489_vm10 = vcmp.le.f32.partialorder %v3777_v27, %v1459_v63 }
 0x5dc   : > { %v3886_v0 = vsel %vm1489_vm10, %v3236_v42, 128 }
 0x5dd   : > { %v1535_v54 = vshra.s32 %v3886_v0, 16 }
 0x5de   : > { %v1457_v60 = vpop.xlane.xlu1 %1456 }
 0x5df   : > { %v3889_v5 = vcvt.s32.f32 %v1535_v54  ;;  %vm1488_vm11 = vcmp.le.f32.partialorder %v3783_v62, %v1457_v60 }
 0x5e0   : > { %v3893_v37 = vsel %vm1488_vm11, %v3236_v42, 128 }
 0x5e1   : > { %v1521_v45 = vshra.s32 %v3893_v37, 16  ;;  %1538 = vmin.xlane.f32.xlu0 %v3889_v5 }
 0x5e2   : > { %v1463_v58 = vpop.xlane.xlu0 %1462 }
 0x5e3   : > { %v3897_v10 = vcvt.s32.f32 %v1521_v45  ;;  %vm1491_vm12 = vcmp.le.f32.partialorder %v3791_v18, %v1463_v58 }
 0x5e4   : > { %v3901_v39 = vsel %vm1491_vm12, %v3236_v42, 128 }
 0x5e5   : > { %v1563_v40 = vshra.s32 %v3901_v39, 16  ;;  %1524 = vmin.xlane.f32.xlu1 %v3897_v10 }
 0x5e6   : > { %v1461_v3 = vpop.xlane.xlu1 %1460 }
 0x5e7   : > { %v3905_v36 = vcvt.s32.f32 %v1563_v40  ;;  %vm1490_vm13 = vcmp.le.f32.partialorder %v3797_v47, %v1461_v3 }
 0x5e8   : > { %v3909_v19 = vsel %vm1490_vm13, %v3236_v42, 128 }
 0x5e9   : > { %v1549_v28 = vshra.s32 %v3909_v19, 16  ;;  %1566 = vmin.xlane.f32.xlu0 %v3905_v36 }
 0x5ea   : > { %v1467_v11 = vpop.xlane.xlu0 %1466 }
 0x5eb   : > { %v3913_v6 = vcvt.s32.f32 %v1549_v28  ;;  %vm1493_vm14 = vcmp.le.f32.partialorder %v3805_v50, %v1467_v11 }
 0x5ec   : > { %v3917_v8 = vsel %vm1493_vm14, %v3236_v42, 128 }
 0x5ed   : > { %v1591_v30 = vshra.s32 %v3917_v8, 16  ;;  %1552 = vmin.xlane.f32.xlu1 %v3913_v6 }
 0x5ee   : > { %v1465_v2 = vpop.xlane.xlu1 %1464 }
 0x5ef   : > { %v3921_v44 = vcvt.s32.f32 %v1591_v30  ;;  %vm1492_vm15 = vcmp.le.f32.partialorder %v3811_v26, %v1465_v2 }
 0x5f0   : > { %v3925_v49 = vsel %vm1492_vm15, %v3236_v42, 128 }
 0x5f1   : > { %v1577_v16 = vshra.s32 %v3925_v49, 16  ;;  %1594 = vmin.xlane.f32.xlu0 %v3921_v44 }
 0x5f2   : > { %v1471_v12 = vpop.xlane.xlu0 %1470 }
 0x5f3   : > { %v3929_v43 = vcvt.s32.f32 %v1577_v16  ;;  %vm1495_vm0 = vcmp.le.f32.partialorder %v3819_v13, %v1471_v12 }
 0x5f4   : > { %v3933_v15 = vsel %vm1495_vm0, %v3236_v42, 128 }
 0x5f5   : > { %v1619_v61 = vshra.s32 %v3933_v15, 16  ;;  %1580 = vmin.xlane.f32.xlu1 %v3929_v43 }
 0x5f6   : > { %v1469_v29 = vpop.xlane.xlu1 %1468 }
 0x5f7   : > { %v3937_v7 = vcvt.s32.f32 %v1619_v61  ;;  %vm1494_vm1 = vcmp.le.f32.partialorder %v3825_v23, %v1469_v29 }
 0x5f8   : > { %v3941_v52 = vsel %vm1494_vm1, %v3236_v42, 128 }
 0x5f9   : > { %v1605_v38 = vshra.s32 %v3941_v52, 16  ;;  %1622 = vmin.xlane.f32.xlu0 %v3937_v7 }
 0x5fa   : > { %v1475_v55 = vpop.xlane.xlu0 %1474 }
 0x5fb   : > { %v3945_v21 = vcvt.s32.f32 %v1605_v38  ;;  %vm1497_vm2 = vcmp.le.f32.partialorder %v3833_v41, %v1475_v55 }
 0x5fc   : > { %v3949_v31 = vsel %vm1497_vm2, %v3236_v42, 128 }
 0x5fd   : > { %v1647_v57 = vshra.s32 %v3949_v31, 16  ;;  %1608 = vmin.xlane.f32.xlu1 %v3945_v21 }
 0x5fe   : > { %v1473_v34 = vpop.xlane.xlu1 %1472 }
 0x5ff   : > { %v3953_v59 = vcvt.s32.f32 %v1647_v57  ;;  %vm1496_vm3 = vcmp.le.f32.partialorder %v3839_v46, %v1473_v34 }
 0x600   : > { %v3957_v53 = vsel %vm1496_vm3, %v3236_v42, 128 }
 0x601   : > { %v1633_v33 = vshra.s32 %v3957_v53, 16  ;;  %1650 = vmin.xlane.f32.xlu0 %v3953_v59 }
 0x602   : > { %v1477_v48 = vpop.xlane.xlu1 %1476 }
 0x603   : > { %v3961_v56 = vcvt.s32.f32 %v1633_v33  ;;  %vm1498_vm4 = vcmp.le.f32.partialorder %v3848_v20, %v1477_v48  ;;  %v1534_v33 = vand.u32 65535, %v3886_v0 }
 0x604   : > { %v3965_v32 = vsel %vm1498_vm4, %v3236_v42, 128 }
 0x605   : > { %v1661_v9 = vshra.s32 %v3965_v32, 16  ;;  %1636 = vmin.xlane.f32.xlu1 %v3961_v56  ;;  %v1536_v48 = vcvt.s32.f32 %v1534_v33 }
 0x606   : > { %v1479_v14 = vpop.xlane.xlu0 %1478 }
 0x607   : > { %v3969_v4 = vcvt.s32.f32 %v1661_v9  ;;  %vm1499_vm5 = vcmp.le.f32.partialorder %v3854_v24, %v1479_v14  ;;  %v1520_v9 = vand.u32 65535, %v3893_v37  ;;  %v1548_v37 = vand.u32 65535, %v3909_v19 }
 0x608   : > { %v3973_v63 = vsel %vm1499_vm5, %v3236_v42, 128 }
 0x609   : > { %v1675_v54 = vshra.s32 %v3973_v63, 16  ;;  %1664 = vmin.xlane.f32.xlu1 %v3969_v4 }
 0x60a   : > { %v1481_v60 = vpop.xlane.xlu1 %1480  ;;  %v1483_v45 = vpop.xlane.xlu0 %1482 }
 0x60b   : > { %v3977_v58 = vcvt.s32.f32 %v1675_v54  ;;  %vm1500_vm6 = vcmp.le.f32.partialorder %v3863_v22, %v1481_v60  ;;  %vm1501_vm7 = vcmp.le.f32.partialorder %v3866_v25, %v1483_v45  ;;  %v1522_v60 = vcvt.s32.f32 %v1520_v9 }
 0x60c   : > { %v3982_v40 = vsel %vm1500_vm6, %v3236_v42, 128  ;;  %v3985_v3 = vsel %vm1501_vm7, %v3236_v42, 128  ;;  %v1562_v45 = vand.u32 65535, %v3901_v39  ;;  %v1590_v39 = vand.u32 65535, %v3917_v8 }
 0x60d   : > { %v1689_v28 = vshra.s32 %v3982_v40, 16  ;;  %v1703_v11 = vshra.s32 %v3985_v3, 16  ;;  %1678 = vmin.xlane.f32.xlu0 %v3977_v58  ;;  %v1618_v8 = vand.u32 65535, %v3933_v15 }
 0x60e   : > { %v1485_v30 = vpop.xlane.xlu1 %1484  ;;  %v1564_v0 = vcvt.s32.f32 %v1562_v45  ;;  %v1592_v19 = vcvt.s32.f32 %v1590_v39  ;;  %v1646_v45 = vand.u32 65535, %v3949_v31  ;;  %v1632_v31 = vand.u32 65535, %v3957_v53 }
 0x60f   : > { %v3990_v2 = vcvt.s32.f32 %v1689_v28  ;;  %v3992_v16 = vcvt.s32.f32 %v1703_v11  ;;  %vm1502_vm8 = vcmp.le.f32.partialorder %v3872_v51, %v1485_v30  ;;  %v1674_v53 = vand.u32 65535, %v3973_v63 }
 0x610   : > { %v3996_v12 = vsel %vm1502_vm8, %v3236_v42, 128 }
 0x611   : > { %1692 = vmin.xlane.f32.xlu1 %v3990_v2  ;;  %1706 = vmin.xlane.f32.xlu0 %v3992_v16  ;;  %v1717_v61 = vshra.s32 %v3996_v12, 16 }
 0x612   : > { %v1487_v29 = vpop.xlane.xlu0 %1486 }
 0x613   : > { %vm1503_vm10 = vcmp.le.f32.partialorder %v3879_v35, %v1487_v29  ;;  %v4002_v38 = vcvt.s32.f32 %v1717_v61  ;;  %v1550_v61 = vcvt.s32.f32 %v1548_v37 }
 0x614   : > { %v4005_v55 = vsel %vm1503_vm10, %v3236_v42, 128 }
 0x615   : > { %v1731_v57 = vshra.s32 %v4005_v55, 16  ;;  %1720 = vmin.xlane.f32.xlu1 %v4002_v38 }
 0x617   : > { %v4009_v34 = vcvt.s32.f32 %v1731_v57  ;;  %v1576_v57 = vand.u32 65535, %v3925_v49  ;;  %v1620_v49 = vcvt.s32.f32 %v1618_v8 }
 0x619   : > { %1734 = vmin.xlane.f32.xlu0 %v4009_v34 }
 0x66e   : > { %v4014_v14 = vpop.xlane.xlu0 %1538 }
 0x66f   : > { %vm1540_vm11 = vcmp.eq.f32.partialorder %v3889_v5, %v4014_v14 }
 0x670   : > { %v1541_v54 = vsel %vm1540_vm11, %v1536_v48, inf  ;;  %v1578_v48 = vcvt.s32.f32 %v1576_v57  ;;  %v1676_v57 = vcvt.s32.f32 %v1674_v53 }
 0x671   : > { %1542 = vmin.xlane.f32.xlu0 %v1541_v54  ;;  %v1604_v54 = vand.u32 65535, %v3941_v52 }
 0x672   : > { %v4019_v28 = vpop.xlane.xlu1 %1524 }
 0x673   : > { %vm1526_vm12 = vcmp.eq.f32.partialorder %v3897_v10, %v4019_v28  ;;  %v1606_v15 = vcvt.s32.f32 %v1604_v54 }
 0x674   : > { %v1527_v11 = vsel %vm1526_vm12, %v1522_v60, inf }
 0x675   : > { %1528 = vmin.xlane.f32.xlu1 %v1527_v11  ;;  %v1648_v11 = vcvt.s32.f32 %v1646_v45 }
 0x676   : > { %v4024_v30 = vpop.xlane.xlu0 %1566 }
 0x677   : > { %vm1568_vm13 = vcmp.eq.f32.partialorder %v3905_v36, %v4024_v30 }
 0x678   : > { %v1569_v5 = vsel %vm1568_vm13, %v1564_v0, inf }
 0x679   : > { %1570 = vmin.xlane.f32.xlu0 %v1569_v5  ;;  %v1634_v5 = vcvt.s32.f32 %v1632_v31 }
 0x67a   : > { %v4029_v29 = vpop.xlane.xlu1 %1552 }
 0x67b   : > { %vm1554_vm14 = vcmp.eq.f32.partialorder %v3913_v6, %v4029_v29 }
 0x67c   : > { %v1555_v10 = vsel %vm1554_vm14, %v1550_v61, inf }
 0x67d   : > { %1556 = vmin.xlane.f32.xlu1 %v1555_v10 }
 0x67e   : > { %v4034_v33 = vpop.xlane.xlu0 %1594 }
 0x67f   : > { %vm1596_vm15 = vcmp.eq.f32.partialorder %v3921_v44, %v4034_v33 }
 0x680   : > { %v1597_v36 = vsel %vm1596_vm15, %v1592_v19, inf }
 0x681   : > { %1598 = vmin.xlane.f32.xlu0 %v1597_v36  ;;  %v1702_v36 = vand.u32 65535, %v3985_v3 }
 0x682   : > { %v4039_v9 = vpop.xlane.xlu1 %1580 }
 0x683   : > { %vm1582_vm0 = vcmp.eq.f32.partialorder %v3929_v43, %v4039_v9  ;;  %v4056_v43 = vld [vmem:[%s4053_s19] sm:$0xff]   ;;  %v1704_v8 = vcvt.s32.f32 %v1702_v36  ;;  %v1601_v36 = vcvt.f32.s32 %v4034_v33 }
 0x684   : > { %v1583_v6 = vsel %vm1582_vm0, %v1578_v48, inf  ;;  %2570 = vmatmul.mubr.bf16.vlgmr.msra.gmra.mrb[4].mxu1 %v4056_v43  ;;  %2590 = vmatmul.mubr.bf16.vlgmr.msra.gmra.mrb[16].mxu0 %v4056_v43 }
 0x685   : > { %1584 = vmin.xlane.f32.xlu1 %v1583_v6  ;;  %2609 = vmatprep.mubr.msk.bf16.mxu1 %vm2911_vm9, %v2910_v1 }
 0x686   : > { %v4046_v60 = vpop.xlane.xlu0 %1622  ;;  %2629 = vmatprep.mubr.msk.bf16.mxu0 %vm2911_vm9, %v2910_v1 }
 0x687   : > { %vm1624_vm1 = vcmp.eq.f32.partialorder %v3937_v7, %v4046_v60 }
 0x688   : > { %v1625_v44 = vsel %vm1624_vm1, %v1620_v49, inf }
 0x689   : > { %1626 = vmin.xlane.f32.xlu0 %v1625_v44 }
 0x68a   : > { %v4059_v52 = vpop.xlane.xlu1 %1608 }
 0x68b   : > { %vm1610_vm2 = vcmp.eq.f32.partialorder %v3945_v21, %v4059_v52  ;;  %v1660_v21 = vand.u32 65535, %v3965_v32  ;;  %v1688_v32 = vand.u32 65535, %v3982_v40 }
 0x68c   : > { %v1611_v7 = vsel %vm1610_vm2, %v1606_v15, inf }
 0x68d   : > { %1612 = vmin.xlane.f32.xlu1 %v1611_v7  ;;  %v1662_v10 = vcvt.s32.f32 %v1660_v21  ;;  %v1690_v63 = vcvt.s32.f32 %v1688_v32  ;;  %v1573_v21 = vcvt.f32.s32 %v4024_v30 }
 0x68e   : > { %v4070_v0 = vpop.xlane.xlu0 %1650 }
 0x68f   : > { %vm1652_vm3 = vcmp.eq.f32.partialorder %v3953_v59, %v4070_v0  ;;  %v1574_v53 = vshll.u32 %v1573_v21, 16 }
 0x690   : > { %v1653_v37 = vsel %vm1652_vm3, %v1648_v11, inf  ;;  %v1531_v11 = vcvt.f32.s32 %v4019_v28 }
 0x691   : > { %1654 = vmin.xlane.f32.xlu0 %v1653_v37 }
 0x692   : > { %v4075_v61 = vpop.xlane.xlu1 %1636 }
 0x693   : > { %vm1638_vm9 = vcmp.eq.f32.partialorder %v3961_v56, %v4075_v61  ;;  %v1643_v21 = vcvt.f32.s32 %v4075_v61 }
 0x694   : > { %v1639_v39 = vsel %vm1638_vm9, %v1634_v5, inf }
 0x695   : > { %1640 = vmin.xlane.f32.xlu1 %v1639_v39 }
 0x696   : > { %v4080_v19 = vpop.xlane.xlu1 %1664 }
 0x697   : > { %vm1666_vm4 = vcmp.eq.f32.partialorder %v3969_v4, %v4080_v19  ;;  %v1716_v4 = vand.u32 65535, %v3996_v12 }
 0x698   : > { %v1667_v59 = vsel %vm1666_vm4, %v1662_v10, inf }
 0x699   : > { %1668 = vmin.xlane.f32.xlu1 %v1667_v59  ;;  %v1718_v54 = vcvt.s32.f32 %v1716_v4  ;;  %v1559_v59 = vcvt.f32.s32 %v4029_v29  ;;  %v1587_v4 = vcvt.f32.s32 %v4039_v9 }
 0x69a   : > { %v4086_v48 = vpop.xlane.xlu0 %1678 }
 0x69b   : > { %vm1680_vm5 = vcmp.eq.f32.partialorder %v3977_v58, %v4086_v48  ;;  %v1730_v58 = vand.u32 65535, %v4005_v55  ;;  %v1560_v32 = vshll.u32 %v1559_v59, 16 }
 0x69c   : > { %v1681_v56 = vsel %vm1680_vm5, %v1676_v57, inf }
 0x69d   : > { %1682 = vmin.xlane.f32.xlu0 %v1681_v56  ;;  %v1732_v12 = vcvt.s32.f32 %v1730_v58  ;;  %v1588_v58 = vshll.u32 %v1587_v4, 16 }
 0x69e   : > { %v4090_v6 = vpop.xlane.xlu1 %1692  ;;  %v4092_v49 = vpop.xlane.xlu0 %1706 }
 0x69f   : > { %vm1694_vm6 = vcmp.eq.f32.partialorder %v3990_v2, %v4090_v6  ;;  %vm1708_vm7 = vcmp.eq.f32.partialorder %v3992_v16, %v4092_v49  ;;  %v1545_v16 = vcvt.f32.s32 %v4014_v14 }
 0x6a0   : > { %v1695_v40 = vsel %vm1694_vm6, %v1690_v63, inf  ;;  %v1709_v3 = vsel %vm1708_vm7, %v1704_v8, inf  ;;  %v1602_v8 = vshll.u32 %v1601_v36, 16 }
 0x6a1   : > { %1696 = vmin.xlane.f32.xlu1 %v1695_v40  ;;  %1710 = vmin.xlane.f32.xlu0 %v1709_v3  ;;  %v1546_v55 = vshll.u32 %v1545_v16, 16  ;;  %v1615_v16 = vcvt.f32.s32 %v4059_v52 }
 0x6a2   : > { %v4100_v44 = vpop.xlane.xlu1 %1720 }
 0x6a3   : > { %vm1722_vm8 = vcmp.eq.f32.partialorder %v4002_v38, %v4100_v44  ;;  %v1532_v38 = vshll.u32 %v1531_v11, 16  ;;  %v1616_v11 = vshll.u32 %v1615_v16, 16 }
 0x6a4   : > { %v1723_v15 = vsel %vm1722_vm8, %v1718_v54, inf  ;;  %v1629_v54 = vcvt.f32.s32 %v4046_v60 }
 0x6a5   : > { %1724 = vmin.xlane.f32.xlu1 %v1723_v15 }
 0x6a6   : > { %v4104_v45 = vpop.xlane.xlu0 %1734 }
 0x6a7   : > { %vm1736_vm10 = vcmp.eq.f32.partialorder %v4009_v34, %v4104_v45 }
 0x6a8   : > { %v1737_v2 = vsel %vm1736_vm10, %v1732_v12, inf }
 0x6a9   : > { %1738 = vmin.xlane.f32.xlu0 %v1737_v2  ;;  %v1630_v2 = vshll.u32 %v1629_v54, 16  ;;  %v1727_v54 = vcvt.f32.s32 %v4100_v44 }
 0x6ab   : > { %v1728_v44 = vshll.u32 %v1727_v54, 16 }
 0x6fe   : > { %v1543_v7 = vpop.xlane.xlu0 %1542 }
 0x6ff   : > { %v1544_v31 = vcvt.f32.s32 %v1543_v7 }
 0x701   : > { %v1547_v37 = vadd.s32 %v1546_v55, %v1544_v31  ;;  %v1657_v31 = vcvt.f32.s32 %v4070_v0 }
 0x702   : > { %v1529_v5 = vpop.xlane.xlu1 %1528 }
 0x703   : > { %v1530_v39 = vcvt.f32.s32 %v1529_v5  ;;  %vm1745_vm11 = vcmp.eq.s32.totalorder %v3236_v42, %v1547_v37 }
 0x704   : > { %v4113_v10 = vsel %vm1745_vm11, inf, %v3777_v27 }
 0x705   : > { %v1533_v34 = vadd.s32 %v1532_v38, %v1530_v39  ;;  %1845 = vmin.xlane.f32.xlu0 %v4113_v10  ;;  %v1658_v38 = vshll.u32 %v1657_v31, 16 }
 0x706   : > { %v1571_v14 = vpop.xlane.xlu0 %1570 }
 0x707   : > { %v1572_v28 = vcvt.f32.s32 %v1571_v14  ;;  %vm1744_vm12 = vcmp.eq.s32.totalorder %v3236_v42, %v1533_v34  ;;  %v1644_v14 = vshll.u32 %v1643_v21, 16 }
 0x708   : > { %v4119_v57 = vsel %vm1744_vm12, inf, %v3783_v62  ;;  %vm2425_vm13 = vmpackc.low %vm1745_vm11, %vm1744_vm12 }
 0x709   : > { %v1575_v30 = vadd.s32 %v1574_v53, %v1572_v28  ;;  %1843 = vmin.xlane.f32.xlu1 %v4119_v57  ;;  %2594 = vmatpush3.bf16.xpose.msk.msra.mxu1 %vm2425_vm13, %v2912_v17  ;;  %v1671_v53 = vcvt.f32.s32 %v4080_v19 }
 0x70a   : > { %v1557_v27 = vpop.xlane.xlu1 %1556  ;;  %2595 = vmatprep.subr.bf16.mxu1 %v2910_v1 }
 0x70b   : > { %v1558_v56 = vcvt.f32.s32 %v1557_v27  ;;  %vm1747_vm14 = vcmp.eq.s32.totalorder %v3236_v42, %v1575_v30  ;;  %v1672_v30 = vshll.u32 %v1671_v53, 16  ;;  %v1685_v27 = vcvt.f32.s32 %v4086_v48 }
 0x70c   : > { %v4127_v29 = vsel %vm1747_vm14, inf, %v3791_v18  ;;  %v1713_v48 = vcvt.f32.s32 %v4092_v49 }
 0x70d   : > { %v1561_v62 = vadd.s32 %v1560_v32, %v1558_v56  ;;  %1849 = vmin.xlane.f32.xlu0 %v4127_v29 }
 0x70e   : > { %v1599_v63 = vpop.xlane.xlu0 %1598 }
 0x70f   : > { %v1600_v40 = vcvt.f32.s32 %v1599_v63  ;;  %vm1746_vm15 = vcmp.eq.s32.totalorder %v3236_v42, %v1561_v62  ;;  %v1686_v62 = vshll.u32 %v1685_v27, 16 }
 0x710   : > { %v4133_v3 = vsel %vm1746_vm15, inf, %v3797_v47  ;;  %vm2427_vm0 = vmpackc.low %vm1747_vm14, %vm1746_vm15 }
 0x711   : > { %v1603_v33 = vadd.s32 %v1602_v8, %v1600_v40  ;;  %1847 = vmin.xlane.f32.xlu1 %v4133_v3  ;;  %2596 = vmatpush3.bf16.xpose.msk.msra.mxu1 %vm2427_vm0, %v2912_v17 }
 0x712   : > { %v1585_v18 = vpop.xlane.xlu1 %1584  ;;  %2597 = vmatprep.subr.bf16.mxu1 %v2910_v1 }
 0x713   : > { %v1586_v15 = vcvt.f32.s32 %v1585_v18  ;;  %vm1749_vm1 = vcmp.eq.s32.totalorder %v3236_v42, %v1603_v33  ;;  %v1714_v18 = vshll.u32 %v1713_v48, 16 }
 0x714   : > { %v4141_v9 = vsel %vm1749_vm1, inf, %v3805_v50 }
 0x715   : > { %v1589_v47 = vadd.s32 %v1588_v58, %v1586_v15  ;;  %1853 = vmin.xlane.f32.xlu0 %v4141_v9 }
 0x716   : > { %v1627_v12 = vpop.xlane.xlu0 %1626 }
 0x717   : > { %v1628_v7 = vcvt.f32.s32 %v1627_v12  ;;  %vm1748_vm2 = vcmp.eq.s32.totalorder %v3236_v42, %v1589_v47  ;;  %v1741_v47 = vcvt.f32.s32 %v4104_v45 }
 0x718   : > { %v4147_v55 = vsel %vm1748_vm2, inf, %v3811_v26  ;;  %vm2429_vm3 = vmpackc.low %vm1749_vm1, %vm1748_vm2 }
 0x719   : > { %v1631_v60 = vadd.s32 %v1630_v2, %v1628_v7  ;;  %1851 = vmin.xlane.f32.xlu1 %v4147_v55  ;;  %2598 = vmatpush3.bf16.xpose.msk.msra.mxu1 %vm2429_vm3, %v2912_v17 }
 0x71a   : > { %v1613_v50 = vpop.xlane.xlu1 %1612  ;;  %2599 = vmatprep.subr.bf16.mxu1 %v2910_v1 }
 0x71b   : > { %v1614_v37 = vcvt.f32.s32 %v1613_v50  ;;  %vm1751_vm9 = vcmp.eq.s32.totalorder %v3236_v42, %v1631_v60  ;;  %v1742_v60 = vshll.u32 %v1741_v47, 16 }
 0x71c   : > { %v4155_v52 = vsel %vm1751_vm9, inf, %v3819_v13 }
 0x71d   : > { %v1617_v26 = vadd.s32 %v1616_v11, %v1614_v37  ;;  %1857 = vmin.xlane.f32.xlu0 %v4155_v52 }
 0x71e   : > { %v1655_v5 = vpop.xlane.xlu0 %1654 }
 0x71f   : > { %v1656_v39 = vcvt.f32.s32 %v1655_v5  ;;  %vm1750_vm4 = vcmp.eq.s32.totalorder %v3236_v42, %v1617_v26 }
 0x720   : > { %v4161_v34 = vsel %vm1750_vm4, inf, %v3825_v23  ;;  %vm2431_vm5 = vmpackc.low %vm1751_vm9, %vm1750_vm4 }
 0x721   : > { %v1659_v0 = vadd.s32 %v1658_v38, %v1656_v39  ;;  %1855 = vmin.xlane.f32.xlu1 %v4161_v34  ;;  %2600 = vmatpush3.bf16.xpose.msk.msra.mxu1 %vm2431_vm5, %v2912_v17 }
 0x722   : > { %v1641_v13 = vpop.xlane.xlu1 %1640  ;;  %2601 = vmatprep.subr.bf16.mxu1 %v2910_v1 }
 0x723   : > { %v1642_v59 = vcvt.f32.s32 %v1641_v13  ;;  %vm1753_vm6 = vcmp.eq.s32.totalorder %v3236_v42, %v1659_v0 }
 0x724   : > { %v4169_v61 = vsel %vm1753_vm6, inf, %v3833_v41  ;;  %v1699_v41 = vcvt.f32.s32 %v4090_v6 }
 0x725   : > { %v1645_v23 = vadd.s32 %v1644_v14, %v1642_v59  ;;  %1861 = vmin.xlane.f32.xlu0 %v4169_v61 }
 0x726   : > { %v1669_v28 = vpop.xlane.xlu1 %1668  ;;  %v1700_v4 = vshll.u32 %v1699_v41, 16 }
 0x727   : > { %v1670_v32 = vcvt.f32.s32 %v1669_v28  ;;  %vm1752_vm7 = vcmp.eq.s32.totalorder %v3236_v42, %v1645_v23 }
 0x728   : > { %v4175_v36 = vsel %vm1752_vm7, inf, %v3839_v46  ;;  %vm2433_vm8 = vmpackc.low %vm1753_vm6, %vm1752_vm7 }
 0x729   : > { %v1673_v19 = vadd.s32 %v1672_v30, %v1670_v32  ;;  %1859 = vmin.xlane.f32.xlu1 %v4175_v36  ;;  %2602 = vmatpush3.bf16.xpose.msk.msra.mxu1 %vm2433_vm8, %v2912_v17 }
 0x72a   : > { %v1683_v56 = vpop.xlane.xlu0 %1682  ;;  %2603 = vmatprep.subr.bf16.mxu1 %v2910_v1 }
 0x72b   : > { %v1684_v63 = vcvt.f32.s32 %v1683_v56  ;;  %vm1754_vm10 = vcmp.eq.s32.totalorder %v3236_v42, %v1673_v19 }
 0x72c   : > { %v4184_v46 = vsel %vm1754_vm10, inf, %v3848_v20 }
 0x72d   : > { %v1687_v8 = vadd.s32 %v1686_v62, %v1684_v63  ;;  %1863 = vmin.xlane.f32.xlu1 %v4184_v46 }
 0x72e   : > { %v1697_v40 = vpop.xlane.xlu1 %1696  ;;  %v1711_v33 = vpop.xlane.xlu0 %1710 }
 0x72f   : > { %v1698_v6 = vcvt.f32.s32 %v1697_v40  ;;  %v1712_v58 = vcvt.f32.s32 %v1711_v33  ;;  %vm1755_vm11 = vcmp.eq.s32.totalorder %v3236_v42, %v1687_v8 }
 0x730   : > { %v4190_v49 = vsel %vm1755_vm11, inf, %v3854_v24  ;;  %vm2435_vm12 = vmpackc.low %vm1755_vm11, %vm1754_vm10 }
 0x731   : > { %v1701_v15 = vadd.s32 %v1700_v4, %v1698_v6  ;;  %v1715_v20 = vadd.s32 %v1714_v18, %v1712_v58  ;;  %1865 = vmin.xlane.f32.xlu0 %v4190_v49  ;;  %2604 = vmatpush3.bf16.xpose.msk.msra.mxu1 %vm2435_vm12, %v2912_v17 }
 0x732   : > { %2605 = vmatprep.subr.bf16.mxu1 %v2910_v1  ;;  %v1725_v12 = vpop.xlane.xlu1 %1724 }
 0x733   : > { %vm1756_vm13 = vcmp.eq.s32.totalorder %v3236_v42, %v1701_v15  ;;  %vm1757_vm14 = vcmp.eq.s32.totalorder %v3236_v42, %v1715_v20  ;;  %v1726_v2 = vcvt.f32.s32 %v1725_v12 }
 0x734   : > { %v4199_v24 = vsel %vm1756_vm13, inf, %v3863_v22  ;;  %v4202_v16 = vsel %vm1757_vm14, inf, %v3866_v25  ;;  %vm2437_vm15 = vmpackc.low %vm1757_vm14, %vm1756_vm13 }
 0x735   : > { %1867 = vmin.xlane.f32.xlu1 %v4199_v24  ;;  %1869 = vmin.xlane.f32.xlu0 %v4202_v16  ;;  %v1729_v7 = vadd.s32 %v1728_v44, %v1726_v2 }
 0x736   : > { %v1739_v45 = vpop.xlane.xlu0 %1738 }
 0x737   : > { %v1740_v50 = vcvt.f32.s32 %v1739_v45  ;;  %vm1758_vm0 = vcmp.eq.s32.totalorder %v3236_v42, %v1729_v7 }
 0x738   : > { %v4208_v31 = vsel %vm1758_vm0, inf, %v3872_v51 }
 0x739   : > { %v1743_v11 = vadd.s32 %v1742_v60, %v1740_v50  ;;  %2606 = vmatpush3.bf16.xpose.msk.msra.mxu1 %vm2437_vm15, %v2912_v17  ;;  %1871 = vmin.xlane.f32.xlu1 %v4208_v31 }
 0x73a   : > { %2607 = vmatprep.subr.bf16.mxu1 %v2910_v1 }
 0x73b   : > { %vm1759_vm1 = vcmp.eq.s32.totalorder %v3236_v42, %v1743_v11 }
 0x73c   : > { %v4215_v22 = vsel %vm1759_vm1, inf, %v3879_v35  ;;  %vm2439_vm2 = vmpackc.low %vm1759_vm1, %vm1758_vm0 }
 0x73d   : > { %1873 = vmin.xlane.f32.xlu0 %v4215_v22 }
 0x741   : > { %2608 = vmatpush3.bf16.xpose.msk.msra.mxu1 %vm2439_vm2, %v2912_v17 }
 0x748   : > { %2610 = vmatmul.mubr.bf16.vlgmr.msra.gmra.mrb[8].mxu1 %v4056_v43 }
 0x792   : > { %v1846_v25 = vpop.xlane.xlu0 %1845 }
 0x793   : > { %vm1876_vm3 = vcmp.le.f32.partialorder %v4113_v10, %v1846_v25 }
 0x794   : > { %v4222_v51 = vsel %vm1876_vm3, %v3236_v42, 128 }
 0x795   : > { %v1922_v37 = vshra.s32 %v4222_v51, 16 }
 0x796   : > { %v1844_v26 = vpop.xlane.xlu1 %1843 }
 0x797   : > { %v4225_v5 = vcvt.s32.f32 %v1922_v37  ;;  %vm1875_vm9 = vcmp.le.f32.partialorder %v4119_v57, %v1844_v26 }
 0x798   : > { %v4229_v35 = vsel %vm1875_vm9, %v3236_v42, 128 }
 0x799   : > { %v1908_v38 = vshra.s32 %v4229_v35, 16  ;;  %1925 = vmin.xlane.f32.xlu0 %v4225_v5 }
 0x79a   : > { %v1850_v43 = vpop.xlane.xlu0 %1849 }
 0x79b   : > { %v4233_v21 = vcvt.s32.f32 %v1908_v38  ;;  %vm1878_vm4 = vcmp.le.f32.partialorder %v4127_v29, %v1850_v43  ;;  %v1921_v43 = vand.u32 65535, %v4222_v51 }
 0x79c   : > { %v4237_v10 = vsel %vm1878_vm4, %v3236_v42, 128 }
 0x79d   : > { %v1950_v39 = vshra.s32 %v4237_v10, 16  ;;  %1911 = vmin.xlane.f32.xlu1 %v4233_v21 }
 0x79e   : > { %v1848_v57 = vpop.xlane.xlu1 %1847 }
 0x79f   : > { %v4241_v0 = vcvt.s32.f32 %v1950_v39  ;;  %vm1877_vm5 = vcmp.le.f32.partialorder %v4133_v3, %v1848_v57  ;;  %v1923_v39 = vcvt.s32.f32 %v1921_v43  ;;  %v1907_v57 = vand.u32 65535, %v4229_v35 }
 0x7a0   : > { %v4245_v13 = vsel %vm1877_vm5, %v3236_v42, 128 }
 0x7a1   : > { %v1936_v14 = vshra.s32 %v4245_v13, 16  ;;  %1953 = vmin.xlane.f32.xlu0 %v4241_v0  ;;  %v1935_v35 = vand.u32 65535, %v4245_v13 }
 0x7a2   : > { %v1854_v29 = vpop.xlane.xlu0 %1853 }
 0x7a3   : > { %v4249_v53 = vcvt.s32.f32 %v1936_v14  ;;  %vm1880_vm6 = vcmp.le.f32.partialorder %v4141_v9, %v1854_v29  ;;  %v1909_v29 = vcvt.s32.f32 %v1907_v57 }
 0x7a4   : > { %v4253_v59 = vsel %vm1880_vm6, %v3236_v42, 128 }
 0x7a5   : > { %v1978_v23 = vshra.s32 %v4253_v59, 16  ;;  %1939 = vmin.xlane.f32.xlu1 %v4249_v53 }
 0x7a6   : > { %v1852_v3 = vpop.xlane.xlu1 %1851 }
 0x7a7   : > { %v4257_v28 = vcvt.s32.f32 %v1978_v23  ;;  %vm1879_vm7 = vcmp.le.f32.partialorder %v4147_v55, %v1852_v3  ;;  %v1949_v23 = vand.u32 65535, %v4237_v10  ;;  %v1977_v10 = vand.u32 65535, %v4253_v59 }
 0x7a8   : > { %v4261_v30 = vsel %vm1879_vm7, %v3236_v42, 128 }
 0x7a9   : > { %v1964_v27 = vshra.s32 %v4261_v30, 16  ;;  %1981 = vmin.xlane.f32.xlu0 %v4257_v28  ;;  %v1951_v51 = vcvt.s32.f32 %v1949_v23  ;;  %v1963_v13 = vand.u32 65535, %v4261_v30 }
 0x7aa   : > { %v1858_v9 = vpop.xlane.xlu0 %1857 }
 0x7ab   : > { %v4265_v32 = vcvt.s32.f32 %v1964_v27  ;;  %vm1882_vm8 = vcmp.le.f32.partialorder %v4155_v52, %v1858_v9 }
 0x7ac   : > { %v4269_v19 = vsel %vm1882_vm8, %v3236_v42, 128 }
 0x7ad   : > { %v2006_v41 = vshra.s32 %v4269_v19, 16  ;;  %1967 = vmin.xlane.f32.xlu1 %v4265_v32  ;;  %v2005_v59 = vand.u32 65535, %v4269_v19 }
 0x7ae   : > { %v1856_v55 = vpop.xlane.xlu1 %1855 }
 0x7af   : > { %v4273_v56 = vcvt.s32.f32 %v2006_v41  ;;  %vm1881_vm10 = vcmp.le.f32.partialorder %v4161_v34, %v1856_v55  ;;  %v1937_v41 = vcvt.s32.f32 %v1935_v35  ;;  %v1431_v35 = vpop.f32.mrb[16].mxu0 }
 0x7b0   : > { %v4277_v62 = vsel %vm1881_vm10, %v3236_v42, 128 }
 0x7b1   : > { %v1992_v48 = vshra.s32 %v4277_v62, 16  ;;  %2009 = vmin.xlane.f32.xlu0 %v4273_v56  ;;  %v1991_v30 = vand.u32 65535, %v4277_v62 }
 0x7b2   : > { %v1862_v52 = vpop.xlane.xlu0 %1861 }
 0x7b3   : > { %v4281_v63 = vcvt.s32.f32 %v1992_v48  ;;  %vm1884_vm11 = vcmp.le.f32.partialorder %v4169_v61, %v1862_v52  ;;  %v1979_v48 = vcvt.s32.f32 %v1977_v10 }
 0x7b4   : > { %v4285_v8 = vsel %vm1884_vm11, %v3236_v42, 128 }
 0x7b5   : > { %v2034_v4 = vshra.s32 %v4285_v8, 16  ;;  %1995 = vmin.xlane.f32.xlu1 %v4281_v63  ;;  %v2033_v19 = vand.u32 65535, %v4285_v8 }
 0x7b6   : > { %v1860_v34 = vpop.xlane.xlu1 %1859 }
 0x7b7   : > { %v4289_v40 = vcvt.s32.f32 %v2034_v4  ;;  %vm1883_vm12 = vcmp.le.f32.partialorder %v4175_v36, %v1860_v34  ;;  %v1965_v4 = vcvt.s32.f32 %v1963_v13 }
 0x7b8   : > { %v4293_v33 = vsel %vm1883_vm12, %v3236_v42, 128 }
 0x7b9   : > { %v2020_v18 = vshra.s32 %v4293_v33, 16  ;;  %2037 = vmin.xlane.f32.xlu0 %v4289_v40  ;;  %v2019_v62 = vand.u32 65535, %v4293_v33 }
 0x7ba   : > { %v1864_v61 = vpop.xlane.xlu1 %1863 }
 0x7bb   : > { %v4297_v6 = vcvt.s32.f32 %v2020_v18  ;;  %vm1885_vm13 = vcmp.le.f32.partialorder %v4184_v46, %v1864_v61  ;;  %v2007_v18 = vcvt.s32.f32 %v2005_v59 }
 0x7bc   : > { %v4301_v58 = vsel %vm1885_vm13, %v3236_v42, 128 }
 0x7bd   : > { %v2048_v54 = vshra.s32 %v4301_v58, 16  ;;  %2023 = vmin.xlane.f32.xlu1 %v4297_v6  ;;  %v2047_v8 = vand.u32 65535, %v4301_v58 }
 0x7be   : > { %v1866_v36 = vpop.xlane.xlu0 %1865 }
 0x7bf   : > { %v4305_v15 = vcvt.s32.f32 %v2048_v54  ;;  %vm1886_vm14 = vcmp.le.f32.partialorder %v4190_v49, %v1866_v36  ;;  %v1993_v54 = vcvt.s32.f32 %v1991_v30 }
 0x7c0   : > { %v4309_v20 = vsel %vm1886_vm14, %v3236_v42, 128 }
 0x7c1   : > { %v2062_v47 = vshra.s32 %v4309_v20, 16  ;;  %2051 = vmin.xlane.f32.xlu1 %v4305_v15  ;;  %v2061_v33 = vand.u32 65535, %v4309_v20 }
 0x7c2   : > { %v1868_v46 = vpop.xlane.xlu1 %1867  ;;  %v1870_v12 = vpop.xlane.xlu0 %1869 }
 0x7c3   : > { %v4313_v44 = vcvt.s32.f32 %v2062_v47  ;;  %vm1887_vm15 = vcmp.le.f32.partialorder %v4199_v24, %v1868_v46  ;;  %vm1888_vm0 = vcmp.le.f32.partialorder %v4202_v16, %v1870_v12  ;;  %v2035_v47 = vcvt.s32.f32 %v2033_v19 }
 0x7c4   : > { %v4318_v2 = vsel %vm1887_vm15, %v3236_v42, 128  ;;  %v4321_v49 = vsel %vm1888_vm0, %v3236_v42, 128  ;;  %v2021_v12 = vcvt.s32.f32 %v2019_v62 }
 0x7c5   : > { %v2076_v7 = vshra.s32 %v4318_v2, 16  ;;  %v2090_v45 = vshra.s32 %v4321_v49, 16  ;;  %2065 = vmin.xlane.f32.xlu0 %v4313_v44  ;;  %v2075_v58 = vand.u32 65535, %v4318_v2 }
 0x7c6   : > { %v1872_v11 = vpop.xlane.xlu1 %1871 }
 0x7c7   : > { %v4326_v60 = vcvt.s32.f32 %v2076_v7  ;;  %v4328_v50 = vcvt.s32.f32 %v2090_v45  ;;  %vm1889_vm1 = vcmp.le.f32.partialorder %v4208_v31, %v1872_v11  ;;  %v2049_v45 = vcvt.s32.f32 %v2047_v8 }
 0x7c8   : > { %v4332_v24 = vsel %vm1889_vm1, %v3236_v42, 128  ;;  %v2077_v43 = vcvt.s32.f32 %v2075_v58 }
 0x7c9   : > { %2079 = vmin.xlane.f32.xlu1 %v4326_v60  ;;  %2093 = vmin.xlane.f32.xlu0 %v4328_v50  ;;  %v2104_v16 = vshra.s32 %v4332_v24, 16  ;;  %v2103_v2 = vand.u32 65535, %v4332_v24 }
 0x7ca   : > { %v1874_v25 = vpop.xlane.xlu0 %1873 }
 0x7cb   : > { %vm1890_vm2 = vcmp.le.f32.partialorder %v4215_v22, %v1874_v25  ;;  %v4338_v37 = vcvt.s32.f32 %v2104_v16  ;;  %v2063_v16 = vcvt.s32.f32 %v2061_v33  ;;  %v2089_v25 = vand.u32 65535, %v4321_v49 }
 0x7cc   : > { %v4341_v26 = vsel %vm1890_vm2, %v3236_v42, 128 }
 0x7cd   : > { %v2118_v38 = vshra.s32 %v4341_v26, 16  ;;  %2107 = vmin.xlane.f32.xlu1 %v4338_v37 }
 0x7cf   : > { %v4345_v31 = vcvt.s32.f32 %v2118_v38 }
 0x7d1   : > { %2121 = vmin.xlane.f32.xlu0 %v4345_v31 }
 0x826   : > { %v4350_v14 = vpop.xlane.xlu0 %1925 }
 0x827   : > { %vm1927_vm3 = vcmp.eq.f32.partialorder %v4225_v5, %v4350_v14 }
 0x828   : > { %v1928_v22 = vsel %vm1927_vm3, %v1923_v39, inf  ;;  %v2091_v39 = vcvt.s32.f32 %v2089_v25 }
 0x829   : > { %1929 = vmin.xlane.f32.xlu0 %v1928_v22  ;;  %v2117_v22 = vand.u32 65535, %v4341_v26  ;;  %v4431_v26 = vpop.f32.mrb[0].mxu1 }
 0x82a   : > { %v4355_v3 = vpop.xlane.xlu1 %1911 }
 0x82b   : > { %vm1913_vm9 = vcmp.eq.f32.partialorder %v4233_v21, %v4355_v3  ;;  %v2119_v24 = vcvt.s32.f32 %v2117_v22  ;;  %v1918_v62 = vcvt.f32.s32 %v4355_v3 }
 0x82c   : > { %v1914_v27 = vsel %vm1913_vm9, %v1909_v29, inf  ;;  %v2105_v29 = vcvt.s32.f32 %v2103_v2 }
 0x82d   : > { %1915 = vmin.xlane.f32.xlu1 %v1914_v27 }
 0x82e   : > { %v4360_v9 = vpop.xlane.xlu0 %1953 }
 0x82f   : > { %vm1955_vm4 = vcmp.eq.f32.partialorder %v4241_v0, %v4360_v9 }
 0x830   : > { %v1956_v5 = vsel %vm1955_vm4, %v1951_v51, inf }
 0x831   : > { %1957 = vmin.xlane.f32.xlu0 %v1956_v5  ;;  %v2552_v5 = vpop.f32.mrb[1].mxu1 }
 0x832   : > { %v4365_v55 = vpop.xlane.xlu1 %1939 }
 0x833   : > { %vm1941_vm5 = vcmp.eq.f32.partialorder %v4249_v53, %v4365_v55  ;;  %v1946_v25 = vcvt.f32.s32 %v4365_v55 }
 0x834   : > { %v1942_v21 = vsel %vm1941_vm5, %v1937_v41, inf  ;;  %v1045_v41 = vpop.f32.mrb[4].mxu1 }
 0x835   : > { %1943 = vmin.xlane.f32.xlu1 %v1942_v21  ;;  %v2571_v21 = vpop.f32.mrb[5].mxu1 }
 0x836   : > { %v4370_v52 = vpop.xlane.xlu0 %1981 }
 0x837   : > { %vm1983_vm6 = vcmp.eq.f32.partialorder %v4257_v28, %v4370_v52 }
 0x838   : > { %v1984_v0 = vsel %vm1983_vm6, %v1979_v48, inf }
 0x839   : > { %1985 = vmin.xlane.f32.xlu0 %v1984_v0  ;;  %v1048_v0 = vpop.f32.mrb[6].mxu1 }
 0x83a   : > { %v4375_v34 = vpop.xlane.xlu1 %1967 }
 0x83b   : > { %vm1969_vm7 = vcmp.eq.f32.partialorder %v4265_v32, %v4375_v34  ;;  %v1974_v55 = vcvt.f32.s32 %v4375_v34 }
 0x83c   : > { %v1970_v53 = vsel %vm1969_vm7, %v1965_v4, inf  ;;  %v1052_v4 = vadd.f32 %v1048_v0, %v1045_v41 }
 0x83d   : > { %1971 = vmin.xlane.f32.xlu1 %v1970_v53 }
 0x83e   : > { %v4380_v61 = vpop.xlane.xlu0 %2009 }
 0x83f   : > { %vm2011_vm8 = vcmp.eq.f32.partialorder %v4273_v56, %v4380_v61 }
 0x840   : > { %v2012_v28 = vsel %vm2011_vm8, %v2007_v18, inf }
 0x841   : > { %2013 = vmin.xlane.f32.xlu0 %v2012_v28 }
 0x842   : > { %v4385_v36 = vpop.xlane.xlu1 %1995 }
 0x843   : > { %vm1997_vm10 = vcmp.eq.f32.partialorder %v4281_v63, %v4385_v36  ;;  %v2002_v34 = vcvt.f32.s32 %v4385_v36 }
 0x844   : > { %v1998_v32 = vsel %vm1997_vm10, %v1993_v54, inf }
 0x845   : > { %1999 = vmin.xlane.f32.xlu1 %v1998_v32  ;;  %v1932_v32 = vcvt.f32.s32 %v4350_v14 }
 0x846   : > { %v4390_v46 = vpop.xlane.xlu0 %2037 }
 0x847   : > { %vm2039_vm11 = vcmp.eq.f32.partialorder %v4289_v40, %v4390_v46 }
 0x848   : > { %v2040_v56 = vsel %vm2039_vm11, %v2035_v47, inf }
 0x849   : > { %2041 = vmin.xlane.f32.xlu0 %v2040_v56 }
 0x84a   : > { %v4395_v7 = vpop.xlane.xlu1 %2023 }
 0x84b   : > { %vm2025_vm12 = vcmp.eq.f32.partialorder %v4297_v6, %v4395_v7  ;;  %v2913_v6 = vmov 0   ;;  %v2030_v36 = vcvt.f32.s32 %v4395_v7 }
 0x84c   : > { %v2026_v63 = vsel %vm2025_vm12, %v2021_v12, inf  ;;  %2721 = vset.pattern.permute.xlu1 %v2913_v6  ;;  %2722 = vset.pattern.permute.xlu0 %v2913_v6  ;;  %v1933_v12 = vshll.u32 %v1932_v32, 16 }
 0x84d   : > { %2027 = vmin.xlane.f32.xlu1 %v2026_v63  ;;  %v1919_v63 = vshll.u32 %v1918_v62, 16 }
 0x84e   : > { %v4400_v11 = vpop.xlane.xlu1 %2051 }
 0x84f   : > { %vm2053_vm13 = vcmp.eq.f32.partialorder %v4305_v15, %v4400_v11 }
 0x850   : > { %v2054_v40 = vsel %vm2053_vm13, %v2049_v45, inf }
 0x851   : > { %2055 = vmin.xlane.f32.xlu1 %v2054_v40  ;;  %v1960_v40 = vcvt.f32.s32 %v4360_v9  ;;  %v1988_v9 = vcvt.f32.s32 %v4370_v52  ;;  %v2016_v52 = vcvt.f32.s32 %v4380_v61  ;;  %v2044_v61 = vcvt.f32.s32 %v4390_v46 }
 0x852   : > { %v4406_v38 = vpop.xlane.xlu0 %2065  ;;  %v2058_v46 = vcvt.f32.s32 %v4400_v11 }
 0x853   : > { %vm2067_vm14 = vcmp.eq.f32.partialorder %v4313_v44, %v4406_v38  ;;  %v1961_v6 = vshll.u32 %v1960_v40, 16  ;;  %v1989_v22 = vshll.u32 %v1988_v9, 16  ;;  %v2072_v7 = vcvt.f32.s32 %v4406_v38 }
 0x854   : > { %v2068_v20 = vsel %vm2067_vm14, %v2063_v16, inf }
 0x855   : > { %2069 = vmin.xlane.f32.xlu0 %v2068_v20  ;;  %v1947_v20 = vshll.u32 %v1946_v25, 16  ;;  %v2073_v11 = vshll.u32 %v2072_v7, 16 }
 0x856   : > { %v4410_v15 = vpop.xlane.xlu1 %2079  ;;  %v4412_v57 = vpop.xlane.xlu0 %2093 }
 0x857   : > { %vm2081_vm15 = vcmp.eq.f32.partialorder %v4326_v60, %v4410_v15  ;;  %vm2095_vm0 = vcmp.eq.f32.partialorder %v4328_v50, %v4412_v57  ;;  %v595_v50 = vld [vmem:[%s4545_s5] sm:$0xff]  ;;  %v2086_v62 = vcvt.f32.s32 %v4410_v15 }
 0x858   : > { %v2082_v44 = vsel %vm2081_vm15, %v2077_v43, inf  ;;  %v2096_v49 = vsel %vm2095_vm0, %v2091_v39, inf }
 0x859   : > { %2083 = vmin.xlane.f32.xlu1 %v2082_v44  ;;  %2097 = vmin.xlane.f32.xlu0 %v2096_v49 }
 0x85a   : > { %v4420_v23 = vpop.xlane.xlu1 %2107 }
 0x85b   : > { %vm2109_vm1 = vcmp.eq.f32.partialorder %v4338_v37, %v4420_v23  ;;  %v2591_v37 = vpop.f32.mrb[17].mxu0 }
 0x85c   : > { %v2110_v27 = vsel %vm2109_vm1, %v2105_v29, inf  ;;  %v1434_v10 = vpop.f32.mrb[18].mxu0  ;;  %v2017_v37 = vshll.u32 %v2016_v52, 16 }
 0x85d   : > { %2111 = vmin.xlane.f32.xlu1 %v2110_v27  ;;  %v1438_v48 = vadd.f32 %v1434_v10, %v1431_v35  ;;  %v2592_v13 = vpop.f32.mrb[19].mxu0  ;;  %v1975_v27 = vshll.u32 %v1974_v55, 16  ;;  %v2003_v10 = vshll.u32 %v2002_v34, 16 }
 0x85e   : > { %v4424_v51 = vpop.xlane.xlu0 %2121 }
 0x85f   : > { %vm2123_vm2 = vcmp.eq.f32.partialorder %v4345_v31, %v4424_v51  ;;  %v2572_v31 = vpop.f32.mrb[7].mxu1  ;;  %v1439_v53 = vmax.f32 %v1052_v4, %v1438_v48 }
 0x860   : > { %v2124_v60 = vsel %vm2123_vm2, %v2119_v24, inf  ;;  %v1818_v59 = vpop.f32.mrb[8].mxu1  ;;  %v2045_v31 = vshll.u32 %v2044_v61, 16 }
 0x861   : > { %2125 = vmin.xlane.f32.xlu0 %v2124_v60  ;;  %v2611_v18 = vpop.f32.mrb[9].mxu1 }
 0x862   : > { %v1821_v30 = vpop.f32.mrb[10].mxu1 }
 0x863   : > { %v1825_v28 = vadd.f32 %v1821_v30, %v1818_v59  ;;  %v2612_v54 = vpop.f32.mrb[11].mxu1 }
 0x865   : > { %v4433_v19 = vmax.f32 %v1439_v53, %v1825_v28  ;;  %v2031_v53 = vshll.u32 %v2030_v36, 16 }
 0x86e   : > { %598 = vperm.xlu1 %2721, %v595_v50  }
 0x8b6   : > { %v1930_v47 = vpop.xlane.xlu0 %1929 }
 0x8b7   : > { %v1931_v56 = vcvt.f32.s32 %v1930_v47  ;;  %v2059_v47 = vshll.u32 %v2058_v46, 16 }
 0x8b9   : > { %v1934_v45 = vadd.s32 %v1933_v12, %v1931_v56  ;;  %v2100_v56 = vcvt.f32.s32 %v4412_v57 }
 0x8ba   : > { %v1916_v8 = vpop.xlane.xlu1 %1915 }
 0x8bb   : > { %v1917_v33 = vcvt.f32.s32 %v1916_v8  ;;  %vm2132_vm3 = vcmp.eq.s32.totalorder %v3236_v42, %v1934_v45  ;;  %v2087_v45 = vshll.u32 %v2086_v62, 16 }
 0x8bd   : > { %v1920_v16 = vadd.s32 %v1919_v63, %v1917_v33  ;;  %v2101_v33 = vshll.u32 %v2100_v56, 16 }
 0x8be   : > { %v1958_v58 = vpop.xlane.xlu0 %1957 }
 0x8bf   : > { %vm2131_vm9 = vcmp.eq.s32.totalorder %v3236_v42, %v1920_v16  ;;  %v1959_v14 = vcvt.f32.s32 %v1958_v58 }
 0x8c0   : > { %vm2441_vm4 = vmpackc.low %vm2132_vm3, %vm2131_vm9 }
 0x8c1   : > { %2614 = vmatpush3.bf16.xpose.msk.msra.mxu0 %vm2441_vm4, %v2912_v17  ;;  %v1962_v43 = vadd.s32 %v1961_v6, %v1959_v14  ;;  %v2128_v14 = vcvt.f32.s32 %v4424_v51 }
 0x8c2   : > { %v1944_v3 = vpop.xlane.xlu1 %1943  ;;  %2615 = vmatprep.subr.bf16.mxu0 %v2910_v1 }
 0x8c3   : > { %v1945_v39 = vcvt.f32.s32 %v1944_v3  ;;  %vm2134_vm5 = vcmp.eq.s32.totalorder %v3236_v42, %v1962_v43  ;;  %v2114_v3 = vcvt.f32.s32 %v4420_v23  ;;  %v2129_v43 = vshll.u32 %v2128_v14, 16  ;;  %v2724_v23 = vld [vmem:[%s4053_s19] sm:$0xff]  }
 0x8c5   : > { %v1948_v2 = vadd.s32 %v1947_v20, %v1945_v39 }
 0x8c6   : > { %v1986_v44 = vpop.xlane.xlu0 %1985 }
 0x8c7   : > { %vm2133_vm6 = vcmp.eq.s32.totalorder %v3236_v42, %v1948_v2  ;;  %v1987_v49 = vcvt.f32.s32 %v1986_v44  ;;  %v2115_v2 = vshll.u32 %v2114_v3, 16 }
 0x8c8   : > { %vm2443_vm7 = vmpackc.low %vm2134_vm5, %vm2133_vm6 }
 0x8c9   : > { %2616 = vmatpush3.bf16.xpose.msk.msra.mxu0 %vm2443_vm7, %v2912_v17  ;;  %v1990_v24 = vadd.s32 %v1989_v22, %v1987_v49 }
 0x8ca   : > { %v1972_v29 = vpop.xlane.xlu1 %1971  ;;  %2617 = vmatprep.subr.bf16.mxu0 %v2910_v1 }
 0x8cb   : > { %v1973_v60 = vcvt.f32.s32 %v1972_v29  ;;  %vm2136_vm8 = vcmp.eq.s32.totalorder %v3236_v42, %v1990_v24 }
 0x8cd   : > { %v1976_v50 = vadd.s32 %v1975_v27, %v1973_v60 }
 0x8ce   : > { %v2014_v35 = vpop.xlane.xlu0 %2013 }
 0x8cf   : > { %vm2135_vm10 = vcmp.eq.s32.totalorder %v3236_v42, %v1976_v50  ;;  %v2015_v5 = vcvt.f32.s32 %v2014_v35 }
 0x8d0   : > { %vm2445_vm11 = vmpackc.low %vm2136_vm8, %vm2135_vm10 }
 0x8d1   : > { %2618 = vmatpush3.bf16.xpose.msk.msra.mxu0 %vm2445_vm11, %v2912_v17  ;;  %v2018_v21 = vadd.s32 %v2017_v37, %v2015_v5 }
 0x8d2   : > { %v2000_v41 = vpop.xlane.xlu1 %1999  ;;  %2619 = vmatprep.subr.bf16.mxu0 %v2910_v1 }
 0x8d3   : > { %v2001_v48 = vcvt.f32.s32 %v2000_v41  ;;  %vm2138_vm12 = vcmp.eq.s32.totalorder %v3236_v42, %v2018_v21 }
 0x8d5   : > { %v2004_v13 = vadd.s32 %v2003_v10, %v2001_v48 }
 0x8d6   : > { %v2042_v0 = vpop.xlane.xlu0 %2041 }
 0x8d7   : > { %vm2137_vm13 = vcmp.eq.s32.totalorder %v3236_v42, %v2004_v13  ;;  %v2043_v4 = vcvt.f32.s32 %v2042_v0 }
 0x8d8   : > { %vm2447_vm14 = vmpackc.low %vm2138_vm12, %vm2137_vm13 }
 0x8d9   : > { %2620 = vmatpush3.bf16.xpose.msk.msra.mxu0 %vm2447_vm14, %v2912_v17  ;;  %v2046_v18 = vadd.s32 %v2045_v31, %v2043_v4 }
 0x8da   : > { %v2028_v59 = vpop.xlane.xlu1 %2027  ;;  %2621 = vmatprep.subr.bf16.mxu0 %v2910_v1 }
 0x8db   : > { %v2029_v30 = vcvt.f32.s32 %v2028_v59  ;;  %vm2140_vm15 = vcmp.eq.s32.totalorder %v3236_v42, %v2046_v18 }
 0x8dd   : > { %v2032_v28 = vadd.s32 %v2031_v53, %v2029_v30 }
 0x8de   : > { %v2056_v54 = vpop.xlane.xlu1 %2055 }
 0x8df   : > { %vm2139_vm0 = vcmp.eq.s32.totalorder %v3236_v42, %v2032_v28  ;;  %v2057_v32 = vcvt.f32.s32 %v2056_v54 }
 0x8e0   : > { %vm2449_vm1 = vmpackc.low %vm2140_vm15, %vm2139_vm0 }
 0x8e1   : > { %2622 = vmatpush3.bf16.xpose.msk.msra.mxu0 %vm2449_vm1, %v2912_v17  ;;  %v2060_v8 = vadd.s32 %v2059_v47, %v2057_v32 }
 0x8e2   : > { %v2070_v12 = vpop.xlane.xlu0 %2069  ;;  %2623 = vmatprep.subr.bf16.mxu0 %v2910_v1 }
 0x8e3   : > { %v2071_v63 = vcvt.f32.s32 %v2070_v12  ;;  %vm2141_vm2 = vcmp.eq.s32.totalorder %v3236_v42, %v2060_v8 }
 0x8e5   : > { %v2074_v38 = vadd.s32 %v2073_v11, %v2071_v63 }
 0x8e6   : > { %v2084_v40 = vpop.xlane.xlu1 %2083  ;;  %v2098_v16 = vpop.xlane.xlu0 %2097 }
 0x8e7   : > { %vm2142_vm3 = vcmp.eq.s32.totalorder %v3236_v42, %v2074_v38  ;;  %v2085_v58 = vcvt.f32.s32 %v2084_v40  ;;  %v2099_v25 = vcvt.f32.s32 %v2098_v16 }
 0x8e8   : > { %vm2451_vm9 = vmpackc.low %vm2142_vm3, %vm2141_vm2 }
 0x8e9   : > { %v2088_v15 = vadd.s32 %v2087_v45, %v2085_v58  ;;  %v2102_v57 = vadd.s32 %v2101_v33, %v2099_v25  ;;  %2624 = vmatpush3.bf16.xpose.msk.msra.mxu0 %vm2451_vm9, %v2912_v17 }
 0x8ea   : > { %2625 = vmatprep.subr.bf16.mxu0 %v2910_v1  ;;  %v2112_v6 = vpop.xlane.xlu1 %2111 }
 0x8eb   : > { %vm2143_vm4 = vcmp.eq.s32.totalorder %v3236_v42, %v2088_v15  ;;  %vm2144_vm5 = vcmp.eq.s32.totalorder %v3236_v42, %v2102_v57  ;;  %v2113_v39 = vcvt.f32.s32 %v2112_v6 }
 0x8ec   : > { %vm2453_vm6 = vmpackc.low %vm2144_vm5, %vm2143_vm4 }
 0x8ed   : > { %v2116_v51 = vadd.s32 %v2115_v2, %v2113_v39 }
 0x8ee   : > { %v2126_v20 = vpop.xlane.xlu0 %2125  ;;  %v599_v22 = vpop.permute.xlu1 %598 }
 0x8ef   : > { %v2127_v9 = vcvt.f32.s32 %v2126_v20  ;;  %vm2145_vm8 = vcmp.eq.s32.totalorder %v3236_v42, %v2116_v51  ;;  %v672_v24 = vadd.f32 %v4431_v26, %v599_v22 }
 0x8f1   : > { %v2130_v44 = vadd.s32 %v2129_v43, %v2127_v9  ;;  %2626 = vmatpush3.bf16.xpose.msk.msra.mxu0 %vm2453_vm6, %v2912_v17 }
 0x8f2   : > { %2627 = vmatprep.subr.bf16.mxu0 %v2910_v1 }
 0x8f3   : > { %vm2146_vm7 = vcmp.eq.s32.totalorder %v3236_v42, %v2130_v44 }
 0x8f4   : > { %vm2455_vm10 = vmpackc.low %vm2146_vm7, %vm2145_vm8 }
 0x8f9   : > { %2628 = vmatpush3.bf16.xpose.msk.msra.mxu0 %vm2455_vm10, %v2912_v17 }
 0x900   : > { %2630 = vmatmul.mubr.bf16.vlgmr.msra.gmra.mrb[20].mxu0 %v2724_v23 }
 0x9d3   : > { %v2205_v55 = vpop.f32.mrb[20].mxu0 }
 0x9d4   : > { %v2631_v49 = vpop.f32.mrb[21].mxu0 }
 0x9d5   : > { %v2208_v29 = vpop.f32.mrb[22].mxu0 }
 0x9d6   : > { %v2212_v27 = vadd.f32 %v2208_v29, %v2205_v55  ;;  %v2632_v1 = vpop.f32.mrb[23].mxu0 }
 0x9d8   : > { %v2213_v60 = vmax.f32 %v4433_v19, %v2212_v27 }
 0x9da   : > { %v2214_v42 = vadd.f32 %v2213_v60, %v672_v24 }
 0x9dc   : > { %v2215_v17 = vmax.f32 %v2214_v42, 0.0 }
 0x9de   : > { %2216 = vst [vmem:[%s351_s0] sm:$0xff] %v2215_v17 }
 0x9df   : > { %2826 = shalt.err (!%p2823_p2)
}
 0x9e0   : > { %s2827_s16 = scalar_lea.hbm %s4491_s15, 128  ;;  %s2831_s28 = scalar_lea.hbm %s4546_s6, 256 }
 0x9e1   : > { %p2828_p6 = scmp.ne.s32.totalorder %s4491_s15, %s2827_s16  ;;  %p2832_p11 = scmp.lt.u32.totalorder %s4491_s15, %s4546_s6 }
 0x9e2   : > { %p2833_p7 = scmp.lt.u32.totalorder %s2831_s28, %s2827_s16  ;;  %p2835_p10 = scmp.lt.u32.totalorder %s2827_s16, %s4491_s15 }
 0x9e3   : > { %p2829_p1 = pnand %p2828_p6, %p4576_p13 }
 0x9e4   : > { %p2834_p8 = por %p2833_p7, %p2832_p11 }
 0x9e5   : > { %p2830_p0 = pneg %p2829_p1 }
 0x9e6   : > { %p2836_p3 = por %p2835_p10, %p2834_p8 }
 0x9e8   : > { %p2837_p5 = pnand %p2836_p3, %p2830_p0 }
 0x9ea   : > { %2840 = shalt.err (!%p2837_p5)
}
 0x9eb   : > { %2645 = dma.vmem_to_hbm [thread:$0]  (%p4576_p13), %s4493_s3, 128, %s4491_s15, %s2218_s7  }
 0x9ec PF: > { %s2244_s19 = sand.u32 1, %s2883_s21   ;;  %p4577_p9 = scmp.ne.s32.totalorder %s4559_s30, 0 }
 0x9ed   : > { %p4578_p4 = scmp.ge.s32.totalorder %s2903_s25, 2  ;;  %s2245_s11 = scalar_lea.sflag [#allocation4], %s2244_s19 }
 0x9ef   : > { %p2659_p12 = pnand %p4578_p4, %p4577_p9 }
 0x9f1   : > { %2878 = dma.done.wait (!%p2659_p12), %s2245_s11, 128  }
 0x9f2   : > { %2880 = vsyncadd (!%p2659_p12), %s2245_s11, 4294967168  ;;  %s25_s25 = sadd.s32 1, %s2903_s25   ;;  %s4579_s24 = sld [smem:[#allocation13_spill]] }
 0x9f3   : > { %p22_p2 = scmp.ge.s32.totalorder %s25_s25, 4   ;;  %s4580_s4 = sld [smem:[#allocation14_spill]] }
 0x9f4   : > { %s4581_s21 = smov %s2887_s22  ;;  %s4582_s22 = smov %s2891_s23 }
 0x9f5   : > { %s4583_s23 = smov %s3065_s18  ;;  %24 = sbr.rel (!%p22_p2) target bundleno = 11 (0xb), region = 109 }
 0x9fc   :  { %2250 = vsyncpa [#allocation3], 1 }
 0x9fd   :  { %2252 = vsyncpa [#allocation3 + $0x1], 1 }
 0x9fe   :  { %2253 = vsyncpa [#allocation6], 1 }
 0x9ff   :  { %2255 = vsyncpa [#allocation6 + $0x1], 1 }
 0xa00   :  { %2256 = vsyncpa [#allocation4], 1 }
 0xa01   :  { %2258 = vsyncpa [#allocation4 + $0x1], 1 }

</bundles_post_ra>
